<compile_context>
chip_gen: v6e
topology: v6e:2x2x1
jax: 0.10.0
libtpu: 0.0.40
codegen_flags: <defaults>
</compile_context>

<pallas_src>
import math
import jax
import jax.numpy as jnp
import numpy as np
from jax.experimental import pallas as pl
from jax.experimental.pallas import tpu as pltpu

LN_EPS = 1e-5


def _layernorm(x, gamma, beta):
    mu = jnp.mean(x, axis=-1, keepdims=True)
    var = jnp.mean((x - mu) ** 2, axis=-1, keepdims=True)
    return (x - mu) * jax.lax.rsqrt(var + LN_EPS) * gamma + beta


def make_decoder_layer_kernel(n_heads, d_head, tq):
    scale = 1.0 / math.sqrt(d_head)
    D = n_heads * d_head

    def split_heads(t):
        # (S, D) f32 -> (H, S, dh) bf16 for the MXU
        s = t.shape[0]
        return jnp.transpose(t.reshape(s, n_heads, d_head), (1, 0, 2)).astype(jnp.bfloat16)

    def proj(x_bf16, w_ref, b_ref):
        # bf16 operands, f32 MXU accumulation, f32 bias add
        return jnp.dot(x_bf16, w_ref[...], preferred_element_type=jnp.float32) + b_ref[...]

    def attend(q_f32, k_heads, v_heads, wo_ref, bo_ref):
        # q_f32: (TQ, D), already scaled by 1/sqrt(dh). k/v: (H, Sk, dh) bf16 from scratch.
        qh = split_heads(q_f32)                                       # (H, TQ, dh) bf16
        s = jnp.einsum("hqd,hkd->hqk", qh, k_heads,
                       preferred_element_type=jnp.float32)            # (H, TQ, Sk) f32
        s = s - jnp.max(s, axis=-1, keepdims=True)
        p = jnp.exp(s)
        denom = jnp.sum(p, axis=-1, keepdims=True)                    # (H, TQ, 1)
        ctx = jnp.einsum("hqk,hkd->hqd", p.astype(jnp.bfloat16), v_heads,
                         preferred_element_type=jnp.float32)          # (H, TQ, dh) f32
        # Deferred softmax normalization on the small (H,TQ,dh) tensor.
        ctx = ctx * pl.reciprocal(denom, approx=True)
        # Head-merge + output projection without transposing the context:
        # per-head (TQ,dh)@(dh,D) batched matmul, then a cheap VPU sum over heads.
        wo_heads = wo_ref[...].reshape(n_heads, d_head, D)            # bf16 (H, dh, D)
        oh = jnp.einsum("hqd,hde->hqe", ctx.astype(jnp.bfloat16), wo_heads,
                        preferred_element_type=jnp.float32)           # (H, TQ, D) f32
        return jnp.sum(oh, axis=0) + bo_ref[...]                      # (TQ, D) f32

    def kernel(tgt_ref, mem_ref,
               wq_s, wk_s, wv_s, bq_s, bk_s, bv_s, wo_s, bo_s, g1, b1,
               wq_c, wk_c, wv_c, bq_c, bk_c, bv_c, wo_c, bo_c, g2, b2,
               w1, bf1, w2, bf2, g3, b3,
               o_ref,
               ks_scr, vs_scr, kc_scr, vc_scr):
        qi = pl.program_id(1)

        # ---- K/V projections: once per batch element, cached in VMEM scratch ----
        @pl.when(qi == 0)
        def _():
            xkv_bf = tgt_ref[0].astype(jnp.bfloat16)   # hoisted casts: one per tensor
            xm_bf = mem_ref[0].astype(jnp.bfloat16)
            ks_scr[...] = split_heads(proj(xkv_bf, wk_s, bk_s))
            vs_scr[...] = split_heads(proj(xkv_bf, wv_s, bv_s))
            kc_scr[...] = split_heads(proj(xm_bf, wk_c, bk_c))
            vc_scr[...] = split_heads(proj(xm_bf, wv_c, bv_c))

        # ---- query-row tile sliced from the resident full tgt block ----
        row0 = pl.multiple_of(qi * tq, tq)
        xq = tgt_ref[0, pl.ds(row0, tq), :]            # (TQ, D) f32

        # ---- self attention + residual + norm1 ----
        q = proj(xq.astype(jnp.bfloat16), wq_s, bq_s) * scale
        a = attend(q, ks_scr[...], vs_scr[...], wo_s, bo_s)
        y = _layernorm(xq + a, g1[...], b1[...])

        # ---- cross attention (q from y, k/v from memory) + residual + norm2 ----
        qc = proj(y.astype(jnp.bfloat16), wq_c, bq_c) * scale
        a2 = attend(qc, kc_scr[...], vc_scr[...], wo_c, bo_c)
        y2 = _layernorm(y + a2, g2[...], b2[...])

        # ---- position-wise feed forward + residual + norm3 ----
        h1 = jnp.maximum(proj(y2.astype(jnp.bfloat16), w1, bf1), 0.0)
        ff = proj(h1.astype(jnp.bfloat16), w2, bf2)
        z = _layernorm(y2 + ff, g3[...], b3[...])

        o_ref[0] = z.astype(o_ref.dtype)

    return kernel


def _pick_q_tile(s, max_tile=512):
    """Query-row tile: full S if small, else the largest divisor <= max_tile that is a
    multiple of 8 (f32 sublane)."""
    if s <= max_tile:
        return s
    for t in (512, 384, 256, 192, 128, 64, 32, 16, 8):
        if s % t == 0:
            return t
    # TODO(synk): pad S_t to a multiple of 8 (with query masking) instead of this fallback.
    return s


def _vmem_limit_bytes():
    try:
        cap = pltpu.get_tpu_info().vmem_capacity_bytes
    except Exception:
        cap = 64 * 1024 * 1024
    # ~108 MiB on 128-MiB chips (v5e/v6e), ~54 MiB on 64-MiB v7x.
    return min(int(cap * 0.85), 110 * 1024 * 1024)


def prepare_params(params):
    """Cast matmul weights to bf16 once, outside the per-call path (biases/LN stay f32)."""
    out = dict(params)
    for k in ("wq_s", "wk_s", "wv_s", "wo_s",
              "wq_c", "wk_c", "wv_c", "wo_c", "w1", "w2"):
        out[k] = out[k].astype(jnp.bfloat16)
    return out


def decoder_layer_pallas(tgt, memory, params, n_heads):
    B, S_t, D = tgt.shape
    Bm, S_m, Dm = memory.shape
    assert B == Bm and D == Dm and D % n_heads == 0
    d_head = D // n_heads
    d_ff = params["w1"].shape[1]

    TQ = _pick_q_tile(S_t)
    n_qt = max(S_t // TQ, 1)

    kernel = make_decoder_layer_kernel(n_heads, d_head, TQ)

    def const_spec(shape):
        # Block index never changes -> fetched once; (v7x) candidate for pl.Buffered(1).
        return pl.BlockSpec(shape, lambda b, qi: (0,) * len(shape))

    in_specs = [
        pl.BlockSpec((1, S_t, D), lambda b, qi: (b, 0, 0)),   # full tgt (queries + self K/V)
        pl.BlockSpec((1, S_m, D), lambda b, qi: (b, 0, 0)),   # memory (cross K/V)
        # self-attention weights/biases (bf16 W, f32 b) + norm1
        const_spec((D, D)), const_spec((D, D)), const_spec((D, D)),
        const_spec((1, D)), const_spec((1, D)), const_spec((1, D)),
        const_spec((D, D)), const_spec((1, D)),
        const_spec((1, D)), const_spec((1, D)),
        # cross-attention weights/biases + norm2
        const_spec((D, D)), const_spec((D, D)), const_spec((D, D)),
        const_spec((1, D)), const_spec((1, D)), const_spec((1, D)),
        const_spec((D, D)), const_spec((1, D)),
        const_spec((1, D)), const_spec((1, D)),
        # FFN + norm3
        const_spec((D, d_ff)), const_spec((1, d_ff)),
        const_spec((d_ff, D)), const_spec((1, D)),
        const_spec((1, D)), const_spec((1, D)),
    ]

    scratch_shapes = [
        pltpu.VMEM((n_heads, S_t, d_head), jnp.bfloat16),   # self K (head-major)
        pltpu.VMEM((n_heads, S_t, d_head), jnp.bfloat16),   # self V
        pltpu.VMEM((n_heads, S_m, d_head), jnp.bfloat16),   # cross K
        pltpu.VMEM((n_heads, S_m, d_head), jnp.bfloat16),   # cross V
    ]

    flops = int(
        2 * B * S_t * D * D * 4                 # self-attn q/k/v/out projections (k/v once)
        + 4 * B * S_t * S_t * D                 # self-attn QK^T + PV
        + 2 * B * S_t * D * D * 2               # cross-attn q + out projections
        + 2 * B * S_m * D * D * 2               # cross-attn k/v projections (once)
        + 4 * B * S_t * S_m * D                 # cross-attn QK^T + PV
        + 4 * B * S_t * D * d_ff)               # FFN
    transcendentals = int(B * n_heads * S_t * (S_t + S_m))
    bytes_accessed = int(
        4 * B * (2 * S_t + S_m) * D             # tgt in + out + memory (f32), read once
        + 2 * (8 * D * D + 2 * D * d_ff)        # bf16 weights
        + 4 * (12 * D + d_ff))                  # biases / LN params

    # TODO(synk): attn_mask / key_padding_mask and dropout are omitted (eval mode, mask=None).
    return pl.pallas_call(
        kernel,
        out_shape=jax.ShapeDtypeStruct((B, S_t, D), tgt.dtype),
        grid=(B, n_qt),
        in_specs=in_specs,
        out_specs=pl.BlockSpec((1, TQ, D), lambda b, qi: (b, qi, 0)),
        scratch_shapes=scratch_shapes,
        compiler_params=pltpu.CompilerParams(
            # b parallel (shards across v7x TensorCores); qi must be arbitrary because the
            # K/V scratch carries across query tiles of one batch element.
            dimension_semantics=("parallel", "arbitrary"),
            vmem_limit_bytes=_vmem_limit_bytes()),
        cost_estimate=pl.CostEstimate(
            flops=flops, transcendentals=transcendentals,
            bytes_accessed=bytes_accessed),
    )(tgt, memory,
      params["wq_s"], params["wk_s"], params["wv_s"],
      params["bq_s"], params["bk_s"], params["bv_s"],
      params["wo_s"], params["bo_s"], params["g1"], params["b1"],
      params["wq_c"], params["wk_c"], params["wv_c"],
      params["bq_c"], params["bk_c"], params["bv_c"],
      params["wo_c"], params["bo_c"], params["g2"], params["b2"],
      params["w1"], params["bf1"], params["w2"], params["bf2"],
      params["g3"], params["b3"])


# ----------------------------- pure-JAX reference -----------------------------
def _ln_ref(t, g, b):
    mu = t.mean(-1, keepdims=True)
    var = ((t - mu) ** 2).mean(-1, keepdims=True)
    return (t - mu) / jnp.sqrt(var + LN_EPS) * g + b


def _mha_ref(q_in, kv_in, wq, wk, wv, bq, bk, bv, wo, bo, n_heads):
    B, Sq, D = q_in.shape
    Sk = kv_in.shape[1]
    dh = D // n_heads
    q = q_in @ wq + bq
    k = kv_in @ wk + bk
    v = kv_in @ wv + bv
    split = lambda t, S: t.reshape(B, S, n_heads, dh).transpose(0, 2, 1, 3)
    qh, kh, vh = split(q, Sq), split(k, Sk), split(v, Sk)
    s = jnp.einsum("bhqd,bhkd->bhqk", qh, kh) / math.sqrt(dh)
    p = jax.nn.softmax(s, axis=-1)
    a = jnp.einsum("bhqk,bhkd->bhqd", p, vh).transpose(0, 2, 1, 3).reshape(B, Sq, D)
    return a @ wo + bo


def decoder_layer_ref(tgt, memory, p, n_heads):
    a = _mha_ref(tgt, tgt, p["wq_s"], p["wk_s"], p["wv_s"],
                 p["bq_s"], p["bk_s"], p["bv_s"], p["wo_s"], p["bo_s"], n_heads)
    y = _ln_ref(tgt + a, p["g1"], p["b1"])
    a2 = _mha_ref(y, memory, p["wq_c"], p["wk_c"], p["wv_c"],
                  p["bq_c"], p["bk_c"], p["bv_c"], p["wo_c"], p["bo_c"], n_heads)
    y2 = _ln_ref(y + a2, p["g2"], p["b2"])
    ff = jnp.maximum(y2 @ p["w1"] + p["bf1"], 0.0) @ p["w2"] + p["bf2"]
    return _ln_ref(y2 + ff, p["g3"], p["b3"])


def init_params(key, d_model, d_ff):
    ks = jax.random.split(key, 13)
    sd = 0.05
    D = d_model
    return {
        "wq_s": jax.random.normal(ks[0], (D, D), jnp.float32) * sd,
        "wk_s": jax.random.normal(ks[1], (D, D), jnp.float32) * sd,
        "wv_s": jax.random.normal(ks[2], (D, D), jnp.float32) * sd,
        "bq_s": jax.random.normal(ks[3], (1, D), jnp.float32) * sd,
        "bk_s": jnp.zeros((1, D), jnp.float32),
        "bv_s": jnp.zeros((1, D), jnp.float32),
        "wo_s": jax.random.normal(ks[4], (D, D), jnp.float32) * sd,
        "bo_s": jnp.zeros((1, D), jnp.float32),
        "g1": jnp.ones((1, D), jnp.float32),
        "b1": jnp.zeros((1, D), jnp.float32),
        "wq_c": jax.random.normal(ks[5], (D, D), jnp.float32) * sd,
        "wk_c": jax.random.normal(ks[6], (D, D), jnp.float32) * sd,
        "wv_c": jax.random.normal(ks[7], (D, D), jnp.float32) * sd,
        "bq_c": jax.random.normal(ks[8], (1, D), jnp.float32) * sd,
        "bk_c": jnp.zeros((1, D), jnp.float32),
        "bv_c": jnp.zeros((1, D), jnp.float32),
        "wo_c": jax.random.normal(ks[9], (D, D), jnp.float32) * sd,
        "bo_c": jnp.zeros((1, D), jnp.float32),
        "g2": jnp.ones((1, D), jnp.float32),
        "b2": jnp.zeros((1, D), jnp.float32),
        "w1": jax.random.normal(ks[10], (D, d_ff), jnp.float32) * sd,
        "bf1": jax.random.normal(ks[11], (1, d_ff), jnp.float32) * sd,
        "w2": jax.random.normal(ks[12], (d_ff, D), jnp.float32) * sd,
        "bf2": jnp.zeros((1, D), jnp.float32),
        "g3": jnp.ones((1, D), jnp.float32),
        "b3": jnp.zeros((1, D), jnp.float32),
    }


if __name__ == "__main__":
    # small shapes consistent with the module: batch=2, tgt_seq=8, mem_seq=16,
    # d_model=32, heads=4, d_ff=64
    B, S_T, S_M, D, H, DFF = 2, 8, 16, 32, 4, 64
    key = jax.random.PRNGKey(0)
    kt, km, kp = jax.random.split(key, 3)
    tgt = jax.random.normal(kt, (B, S_T, D), jnp.float32)
    memory = jax.random.normal(km, (B, S_M, D), jnp.float32)
    params = init_params(kp, D, DFF)

    run_params = prepare_params(params)   # bf16 weights stored once, outside the call path
    out = decoder_layer_pallas(tgt, memory, run_params, H)
    out = jax.block_until_ready(out)

    ref = decoder_layer_ref(tgt, memory, params, H)
    # tolerance relaxed for bf16 matmul operands + approx reciprocal
    np.testing.assert_allclose(np.asarray(out), np.asarray(ref), rtol=5e-2, atol=5e-2)
    print("KERNEL_OK")
</pallas_src>

<mosaic_0001>
module attributes {stable_mosaic.version = 11 : i64} {
  func.func @kernel(%arg0: i32, %arg1: i32, %arg2: memref<1x8x32xf32, #tpu.memory_space<vmem>>, %arg3: memref<1x16x32xf32, #tpu.memory_space<vmem>>, %arg4: memref<32x32xbf16, #tpu.memory_space<vmem>>, %arg5: memref<32x32xbf16, #tpu.memory_space<vmem>>, %arg6: memref<32x32xbf16, #tpu.memory_space<vmem>>, %arg7: memref<1x32xf32, #tpu.memory_space<vmem>>, %arg8: memref<1x32xf32, #tpu.memory_space<vmem>>, %arg9: memref<1x32xf32, #tpu.memory_space<vmem>>, %arg10: memref<32x32xbf16, #tpu.memory_space<vmem>>, %arg11: memref<1x32xf32, #tpu.memory_space<vmem>>, %arg12: memref<1x32xf32, #tpu.memory_space<vmem>>, %arg13: memref<1x32xf32, #tpu.memory_space<vmem>>, %arg14: memref<32x32xbf16, #tpu.memory_space<vmem>>, %arg15: memref<32x32xbf16, #tpu.memory_space<vmem>>, %arg16: memref<32x32xbf16, #tpu.memory_space<vmem>>, %arg17: memref<1x32xf32, #tpu.memory_space<vmem>>, %arg18: memref<1x32xf32, #tpu.memory_space<vmem>>, %arg19: memref<1x32xf32, #tpu.memory_space<vmem>>, %arg20: memref<32x32xbf16, #tpu.memory_space<vmem>>, %arg21: memref<1x32xf32, #tpu.memory_space<vmem>>, %arg22: memref<1x32xf32, #tpu.memory_space<vmem>>, %arg23: memref<1x32xf32, #tpu.memory_space<vmem>>, %arg24: memref<32x64xbf16, #tpu.memory_space<vmem>>, %arg25: memref<1x64xf32, #tpu.memory_space<vmem>>, %arg26: memref<64x32xbf16, #tpu.memory_space<vmem>>, %arg27: memref<1x32xf32, #tpu.memory_space<vmem>>, %arg28: memref<1x32xf32, #tpu.memory_space<vmem>>, %arg29: memref<1x32xf32, #tpu.memory_space<vmem>>, %arg30: memref<1x8x32xf32, #tpu.memory_space<vmem>>, %arg31: memref<4x8x8xbf16, #tpu.memory_space<vmem>>, %arg32: memref<4x8x8xbf16, #tpu.memory_space<vmem>>, %arg33: memref<4x16x8xbf16, #tpu.memory_space<vmem>>, %arg34: memref<4x16x8xbf16, #tpu.memory_space<vmem>>) attributes {dimension_semantics = [#tpu.dimension_semantics<parallel>, #tpu.dimension_semantics<arbitrary>], iteration_bounds = array<i64: 2, 1>, scalar_prefetch = 0 : i64, scratch_operands = 4 : i64, tpu.core_type = #tpu.core_type<tc>, window_params = [{transform_indices = @transform_0, window_bounds = array<i64: 1, 8, 32>}, {transform_indices = @transform_1, window_bounds = array<i64: 1, 16, 32>}, {pipeline_mode = #tpu.pipeline_mode<synchronous>, transform_indices = @transform_2, window_bounds = array<i64: 32, 32>}, {pipeline_mode = #tpu.pipeline_mode<synchronous>, transform_indices = @transform_3, window_bounds = array<i64: 32, 32>}, {pipeline_mode = #tpu.pipeline_mode<synchronous>, transform_indices = @transform_4, window_bounds = array<i64: 32, 32>}, {pipeline_mode = #tpu.pipeline_mode<synchronous>, transform_indices = @transform_5, window_bounds = array<i64: 1, 32>}, {pipeline_mode = #tpu.pipeline_mode<synchronous>, transform_indices = @transform_6, window_bounds = array<i64: 1, 32>}, {pipeline_mode = #tpu.pipeline_mode<synchronous>, transform_indices = @transform_7, window_bounds = array<i64: 1, 32>}, {pipeline_mode = #tpu.pipeline_mode<synchronous>, transform_indices = @transform_8, window_bounds = array<i64: 32, 32>}, {pipeline_mode = #tpu.pipeline_mode<synchronous>, transform_indices = @transform_9, window_bounds = array<i64: 1, 32>}, {pipeline_mode = #tpu.pipeline_mode<synchronous>, transform_indices = @transform_10, window_bounds = array<i64: 1, 32>}, {pipeline_mode = #tpu.pipeline_mode<synchronous>, transform_indices = @transform_11, window_bounds = array<i64: 1, 32>}, {pipeline_mode = #tpu.pipeline_mode<synchronous>, transform_indices = @transform_12, window_bounds = array<i64: 32, 32>}, {pipeline_mode = #tpu.pipeline_mode<synchronous>, transform_indices = @transform_13, window_bounds = array<i64: 32, 32>}, {pipeline_mode = #tpu.pipeline_mode<synchronous>, transform_indices = @transform_14, window_bounds = array<i64: 32, 32>}, {pipeline_mode = #tpu.pipeline_mode<synchronous>, transform_indices = @transform_15, window_bounds = array<i64: 1, 32>}, {pipeline_mode = #tpu.pipeline_mode<synchronous>, transform_indices = @transform_16, window_bounds = array<i64: 1, 32>}, {pipeline_mode = #tpu.pipeline_mode<synchronous>, transform_indices = @transform_17, window_bounds = array<i64: 1, 32>}, {pipeline_mode = #tpu.pipeline_mode<synchronous>, transform_indices = @transform_18, window_bounds = array<i64: 32, 32>}, {pipeline_mode = #tpu.pipeline_mode<synchronous>, transform_indices = @transform_19, window_bounds = array<i64: 1, 32>}, {pipeline_mode = #tpu.pipeline_mode<synchronous>, transform_indices = @transform_20, window_bounds = array<i64: 1, 32>}, {pipeline_mode = #tpu.pipeline_mode<synchronous>, transform_indices = @transform_21, window_bounds = array<i64: 1, 32>}, {pipeline_mode = #tpu.pipeline_mode<synchronous>, transform_indices = @transform_22, window_bounds = array<i64: 32, 64>}, {pipeline_mode = #tpu.pipeline_mode<synchronous>, transform_indices = @transform_23, window_bounds = array<i64: 1, 64>}, {pipeline_mode = #tpu.pipeline_mode<synchronous>, transform_indices = @transform_24, window_bounds = array<i64: 64, 32>}, {pipeline_mode = #tpu.pipeline_mode<synchronous>, transform_indices = @transform_25, window_bounds = array<i64: 1, 32>}, {pipeline_mode = #tpu.pipeline_mode<synchronous>, transform_indices = @transform_26, window_bounds = array<i64: 1, 32>}, {pipeline_mode = #tpu.pipeline_mode<synchronous>, transform_indices = @transform_27, window_bounds = array<i64: 1, 32>}, {transform_indices = @transform_28, window_bounds = array<i64: 1, 8, 32>}]} {
    %c0_i32 = arith.constant 0 : i32
    %0 = arith.cmpi eq, %arg1, %c0_i32 : i32
    %1 = arith.extui %0 : i1 to i32
    %c0_i32_0 = arith.constant 0 : i32
    %2 = arith.cmpi ne, %1, %c0_i32_0 : i32
    scf.if %2 {
      %c0_86 = arith.constant 0 : index
      %c0_87 = arith.constant 0 : index
      %c0_88 = arith.constant 0 : index
      %168 = vector.load %arg2[%c0_86, %c0_87, %c0_88] : memref<1x8x32xf32, #tpu.memory_space<vmem>>, vector<1x8x32xf32>
      %169 = vector.shape_cast %168 : vector<1x8x32xf32> to vector<8x32xf32>
      %170 = arith.truncf %169 : vector<8x32xf32> to vector<8x32xbf16>
      %c0_89 = arith.constant 0 : index
      %c0_90 = arith.constant 0 : index
      %c0_91 = arith.constant 0 : index
      %171 = vector.load %arg3[%c0_89, %c0_90, %c0_91] : memref<1x16x32xf32, #tpu.memory_space<vmem>>, vector<1x16x32xf32>
      %172 = vector.shape_cast %171 : vector<1x16x32xf32> to vector<16x32xf32>
      %173 = arith.truncf %172 : vector<16x32xf32> to vector<16x32xbf16>
      %c0_92 = arith.constant 0 : index
      %c0_93 = arith.constant 0 : index
      %174 = vector.load %arg5[%c0_92, %c0_93] : memref<32x32xbf16, #tpu.memory_space<vmem>>, vector<32x32xbf16>
      %cst_94 = arith.constant dense<0.000000e+00> : vector<8x32xf32>
      %175 = tpu.matmul %170, %174, %cst_94 {dimension_numbers = #tpu.dot_dimension_numbers<[1], [0], [0], [1], [0, 0, 1, 1], [], []>} : vector<8x32xbf16>, vector<32x32xbf16>, vector<8x32xf32> -> vector<8x32xf32>
      %c0_95 = arith.constant 0 : index
      %c0_96 = arith.constant 0 : index
      %176 = vector.load %arg8[%c0_95, %c0_96] : memref<1x32xf32, #tpu.memory_space<vmem>>, vector<1x32xf32>
      %177 = vector.broadcast %176 : vector<1x32xf32> to vector<8x32xf32>
      %178 = arith.addf %175, %177 : vector<8x32xf32>
      %179 = vector.shape_cast %178 : vector<8x32xf32> to vector<8x4x8xf32>
      %180 = tpu.transpose %179, [1, 0, 2] : vector<8x4x8xf32> -> vector<4x8x8xf32>
      %181 = arith.truncf %180 : vector<4x8x8xf32> to vector<4x8x8xbf16>
      %c0_97 = arith.constant 0 : index
      %c0_98 = arith.constant 0 : index
      %c0_99 = arith.constant 0 : index
      %182 = vector.load %arg31[%c0_97, %c0_98, %c0_99] : memref<4x8x8xbf16, #tpu.memory_space<vmem>>, vector<4x8x8xbf16>
      tpu.vector_store %arg31[%c0_97, %c0_98, %c0_99], %181 {strides = array<i32>} : memref<4x8x8xbf16, #tpu.memory_space<vmem>>, vector<4x8x8xbf16>,
      %c0_100 = arith.constant 0 : index
      %c0_101 = arith.constant 0 : index
      %183 = vector.load %arg6[%c0_100, %c0_101] : memref<32x32xbf16, #tpu.memory_space<vmem>>, vector<32x32xbf16>
      %cst_102 = arith.constant dense<0.000000e+00> : vector<8x32xf32>
      %184 = tpu.matmul %170, %183, %cst_102 {dimension_numbers = #tpu.dot_dimension_numbers<[1], [0], [0], [1], [0, 0, 1, 1], [], []>} : vector<8x32xbf16>, vector<32x32xbf16>, vector<8x32xf32> -> vector<8x32xf32>
      %c0_103 = arith.constant 0 : index
      %c0_104 = arith.constant 0 : index
      %185 = vector.load %arg9[%c0_103, %c0_104] : memref<1x32xf32, #tpu.memory_space<vmem>>, vector<1x32xf32>
      %186 = vector.broadcast %185 : vector<1x32xf32> to vector<8x32xf32>
      %187 = arith.addf %184, %186 : vector<8x32xf32>
      %188 = vector.shape_cast %187 : vector<8x32xf32> to vector<8x4x8xf32>
      %189 = tpu.transpose %188, [1, 0, 2] : vector<8x4x8xf32> -> vector<4x8x8xf32>
      %190 = arith.truncf %189 : vector<4x8x8xf32> to vector<4x8x8xbf16>
      %c0_105 = arith.constant 0 : index
      %c0_106 = arith.constant 0 : index
      %c0_107 = arith.constant 0 : index
      %191 = vector.load %arg32[%c0_105, %c0_106, %c0_107] : memref<4x8x8xbf16, #tpu.memory_space<vmem>>, vector<4x8x8xbf16>
      tpu.vector_store %arg32[%c0_105, %c0_106, %c0_107], %190 {strides = array<i32>} : memref<4x8x8xbf16, #tpu.memory_space<vmem>>, vector<4x8x8xbf16>,
      %c0_108 = arith.constant 0 : index
      %c0_109 = arith.constant 0 : index
      %192 = vector.load %arg15[%c0_108, %c0_109] : memref<32x32xbf16, #tpu.memory_space<vmem>>, vector<32x32xbf16>
      %cst_110 = arith.constant dense<0.000000e+00> : vector<16x32xf32>
      %193 = tpu.matmul %173, %192, %cst_110 {dimension_numbers = #tpu.dot_dimension_numbers<[1], [0], [0], [1], [0, 0, 1, 1], [], []>} : vector<16x32xbf16>, vector<32x32xbf16>, vector<16x32xf32> -> vector<16x32xf32>
      %c0_111 = arith.constant 0 : index
      %c0_112 = arith.constant 0 : index
      %194 = vector.load %arg18[%c0_111, %c0_112] : memref<1x32xf32, #tpu.memory_space<vmem>>, vector<1x32xf32>
      %195 = vector.broadcast %194 : vector<1x32xf32> to vector<16x32xf32>
      %196 = arith.addf %193, %195 : vector<16x32xf32>
      %197 = vector.shape_cast %196 : vector<16x32xf32> to vector<16x4x8xf32>
      %198 = tpu.transpose %197, [1, 0, 2] : vector<16x4x8xf32> -> vector<4x16x8xf32>
      %199 = arith.truncf %198 : vector<4x16x8xf32> to vector<4x16x8xbf16>
      %c0_113 = arith.constant 0 : index
      %c0_114 = arith.constant 0 : index
      %c0_115 = arith.constant 0 : index
      %200 = vector.load %arg33[%c0_113, %c0_114, %c0_115] : memref<4x16x8xbf16, #tpu.memory_space<vmem>>, vector<4x16x8xbf16>
      tpu.vector_store %arg33[%c0_113, %c0_114, %c0_115], %199 {strides = array<i32>} : memref<4x16x8xbf16, #tpu.memory_space<vmem>>, vector<4x16x8xbf16>,
      %c0_116 = arith.constant 0 : index
      %c0_117 = arith.constant 0 : index
      %201 = vector.load %arg16[%c0_116, %c0_117] : memref<32x32xbf16, #tpu.memory_space<vmem>>, vector<32x32xbf16>
      %cst_118 = arith.constant dense<0.000000e+00> : vector<16x32xf32>
      %202 = tpu.matmul %173, %201, %cst_118 {dimension_numbers = #tpu.dot_dimension_numbers<[1], [0], [0], [1], [0, 0, 1, 1], [], []>} : vector<16x32xbf16>, vector<32x32xbf16>, vector<16x32xf32> -> vector<16x32xf32>
      %c0_119 = arith.constant 0 : index
      %c0_120 = arith.constant 0 : index
      %203 = vector.load %arg19[%c0_119, %c0_120] : memref<1x32xf32, #tpu.memory_space<vmem>>, vector<1x32xf32>
      %204 = vector.broadcast %203 : vector<1x32xf32> to vector<16x32xf32>
      %205 = arith.addf %202, %204 : vector<16x32xf32>
      %206 = vector.shape_cast %205 : vector<16x32xf32> to vector<16x4x8xf32>
      %207 = tpu.transpose %206, [1, 0, 2] : vector<16x4x8xf32> -> vector<4x16x8xf32>
      %208 = arith.truncf %207 : vector<4x16x8xf32> to vector<4x16x8xbf16>
      %c0_121 = arith.constant 0 : index
      %c0_122 = arith.constant 0 : index
      %c0_123 = arith.constant 0 : index
      %209 = vector.load %arg34[%c0_121, %c0_122, %c0_123] : memref<4x16x8xbf16, #tpu.memory_space<vmem>>, vector<4x16x8xbf16>
      tpu.vector_store %arg34[%c0_121, %c0_122, %c0_123], %208 {strides = array<i32>} : memref<4x16x8xbf16, #tpu.memory_space<vmem>>, vector<4x16x8xbf16>,
    } else {
    }
    %c8_i32 = arith.constant 8 : i32
    %3 = arith.muli %arg1, %c8_i32 : i32
    %4 = tpu.assume_multiple %3, 8 : i32
    %c0 = arith.constant 0 : index
    %5 = arith.index_cast %4 : i32 to index
    %c0_1 = arith.constant 0 : index
    %6 = vector.load %arg2[%c0, %5, %c0_1] : memref<1x8x32xf32, #tpu.memory_space<vmem>>, vector<1x8x32xf32>
    %7 = vector.shape_cast %6 : vector<1x8x32xf32> to vector<8x32xf32>
    %8 = arith.truncf %7 : vector<8x32xf32> to vector<8x32xbf16>
    %c0_2 = arith.constant 0 : index
    %c0_3 = arith.constant 0 : index
    %9 = vector.load %arg4[%c0_2, %c0_3] : memref<32x32xbf16, #tpu.memory_space<vmem>>, vector<32x32xbf16>
    %cst = arith.constant dense<0.000000e+00> : vector<8x32xf32>
    %10 = tpu.matmul %8, %9, %cst {dimension_numbers = #tpu.dot_dimension_numbers<[1], [0], [0], [1], [0, 0, 1, 1], [], []>} : vector<8x32xbf16>, vector<32x32xbf16>, vector<8x32xf32> -> vector<8x32xf32>
    %c0_4 = arith.constant 0 : index
    %c0_5 = arith.constant 0 : index
    %11 = vector.load %arg7[%c0_4, %c0_5] : memref<1x32xf32, #tpu.memory_space<vmem>>, vector<1x32xf32>
    %12 = vector.broadcast %11 : vector<1x32xf32> to vector<8x32xf32>
    %13 = arith.addf %10, %12 : vector<8x32xf32>
    %cst_6 = arith.constant 0.353553385 : f32
    %14 = vector.broadcast %cst_6 : f32 to vector<8x32xf32>
    %15 = arith.mulf %13, %14 : vector<8x32xf32>
    %c0_7 = arith.constant 0 : index
    %c0_8 = arith.constant 0 : index
    %c0_9 = arith.constant 0 : index
    %16 = vector.load %arg31[%c0_7, %c0_8, %c0_9] : memref<4x8x8xbf16, #tpu.memory_space<vmem>>, vector<4x8x8xbf16>
    %c0_10 = arith.constant 0 : index
    %c0_11 = arith.constant 0 : index
    %c0_12 = arith.constant 0 : index
    %17 = vector.load %arg32[%c0_10, %c0_11, %c0_12] : memref<4x8x8xbf16, #tpu.memory_space<vmem>>, vector<4x8x8xbf16>
    %18 = vector.shape_cast %15 : vector<8x32xf32> to vector<8x4x8xf32>
    %19 = tpu.transpose %18, [1, 0, 2] : vector<8x4x8xf32> -> vector<4x8x8xf32>
    %20 = arith.truncf %19 : vector<4x8x8xf32> to vector<4x8x8xbf16>
    "tpu.trace_start"() <{level = 10 : i32, message = "hqd,hkd->hqk"}> : () -> ()
    %cst_13 = arith.constant dense<0.000000e+00> : vector<4x8x8xf32>
    %21 = tpu.matmul %20, %16, %cst_13 {dimension_numbers = #tpu.dot_dimension_numbers<[2], [2], [1], [1], [0, 0, 0, 1, 1, 1], [0], [0]>} : vector<4x8x8xbf16>, vector<4x8x8xbf16>, vector<4x8x8xf32> -> vector<4x8x8xf32>
    "tpu.trace_stop"() : () -> ()
    %cst_14 = arith.constant dense<0xFF800000> : vector<4x8xf32>
    %22 = vector.multi_reduction <maximumf>, %21, %cst_14 [2] : vector<4x8x8xf32> to vector<4x8xf32>
    %23 = vector.shape_cast %22 : vector<4x8xf32> to vector<4x8x1xf32>
    %24 = vector.broadcast %23 : vector<4x8x1xf32> to vector<4x8x8xf32>
    %25 = arith.subf %21, %24 : vector<4x8x8xf32>
    %26 = math.exp %25 : vector<4x8x8xf32>
    %cst_15 = arith.constant dense<0.000000e+00> : vector<4x8xf32>
    %27 = vector.multi_reduction <add>, %26, %cst_15 [2] : vector<4x8x8xf32> to vector<4x8xf32>
    %28 = vector.shape_cast %27 : vector<4x8xf32> to vector<4x8x1xf32>
    %29 = arith.truncf %26 : vector<4x8x8xf32> to vector<4x8x8xbf16>
    "tpu.trace_start"() <{level = 10 : i32, message = "hqk,hkd->hqd"}> : () -> ()
    %cst_16 = arith.constant dense<0.000000e+00> : vector<4x8x8xf32>
    %30 = tpu.matmul %29, %17, %cst_16 {dimension_numbers = #tpu.dot_dimension_numbers<[2], [1], [1], [2], [0, 0, 0, 1, 1, 2], [0], [0]>} : vector<4x8x8xbf16>, vector<4x8x8xbf16>, vector<4x8x8xf32> -> vector<4x8x8xf32>
    "tpu.trace_stop"() : () -> ()
    %31 = tpu.reciprocal %28 {approx = true} : vector<4x8x1xf32> -> vector<4x8x1xf32>
    %32 = vector.broadcast %31 : vector<4x8x1xf32> to vector<4x8x8xf32>
    %33 = arith.mulf %30, %32 : vector<4x8x8xf32>
    %c0_17 = arith.constant 0 : index
    %c0_18 = arith.constant 0 : index
    %34 = vector.load %arg10[%c0_17, %c0_18] : memref<32x32xbf16, #tpu.memory_space<vmem>>, vector<32x32xbf16>
    %35 = vector.shape_cast %34 : vector<32x32xbf16> to vector<4x8x32xbf16>
    %36 = arith.truncf %33 : vector<4x8x8xf32> to vector<4x8x8xbf16>
    "tpu.trace_start"() <{level = 10 : i32, message = "hqd,hde->hqe"}> : () -> ()
    %cst_19 = arith.constant dense<0.000000e+00> : vector<4x8x32xf32>
    %37 = tpu.matmul %36, %35, %cst_19 {dimension_numbers = #tpu.dot_dimension_numbers<[2], [1], [1], [2], [0, 0, 0, 1, 1, 2], [0], [0]>} : vector<4x8x8xbf16>, vector<4x8x32xbf16>, vector<4x8x32xf32> -> vector<4x8x32xf32>
    "tpu.trace_stop"() : () -> ()
    %cst_20 = arith.constant dense<0.000000e+00> : vector<8x32xf32>
    %38 = vector.multi_reduction <add>, %37, %cst_20 [0] : vector<4x8x32xf32> to vector<8x32xf32>
    %c0_21 = arith.constant 0 : index
    %c0_22 = arith.constant 0 : index
    %39 = vector.load %arg11[%c0_21, %c0_22] : memref<1x32xf32, #tpu.memory_space<vmem>>, vector<1x32xf32>
    %40 = vector.broadcast %39 : vector<1x32xf32> to vector<8x32xf32>
    %41 = arith.addf %38, %40 : vector<8x32xf32>
    %42 = arith.addf %7, %41 : vector<8x32xf32>
    %c0_23 = arith.constant 0 : index
    %c0_24 = arith.constant 0 : index
    %43 = vector.load %arg12[%c0_23, %c0_24] : memref<1x32xf32, #tpu.memory_space<vmem>>, vector<1x32xf32>
    %c0_25 = arith.constant 0 : index
    %c0_26 = arith.constant 0 : index
    %44 = vector.load %arg13[%c0_25, %c0_26] : memref<1x32xf32, #tpu.memory_space<vmem>>, vector<1x32xf32>
    %cst_27 = arith.constant dense<0.000000e+00> : vector<8xf32>
    %45 = vector.multi_reduction <add>, %42, %cst_27 [1] : vector<8x32xf32> to vector<8xf32>
    %46 = vector.shape_cast %45 : vector<8xf32> to vector<8x1xf32>
    %cst_28 = arith.constant 3.200000e+01 : f32
    %47 = vector.broadcast %cst_28 : f32 to vector<8x1xf32>
    %48 = arith.divf %46, %47 : vector<8x1xf32>
    %49 = vector.broadcast %48 : vector<8x1xf32> to vector<8x32xf32>
    %50 = arith.subf %42, %49 : vector<8x32xf32>
    %51 = arith.mulf %50, %50 : vector<8x32xf32>
    %cst_29 = arith.constant dense<0.000000e+00> : vector<8xf32>
    %52 = vector.multi_reduction <add>, %51, %cst_29 [1] : vector<8x32xf32> to vector<8xf32>
    %53 = vector.shape_cast %52 : vector<8xf32> to vector<8x1xf32>
    %cst_30 = arith.constant 3.200000e+01 : f32
    %54 = vector.broadcast %cst_30 : f32 to vector<8x1xf32>
    %55 = arith.divf %53, %54 : vector<8x1xf32>
    %56 = vector.broadcast %48 : vector<8x1xf32> to vector<8x32xf32>
    %57 = arith.subf %42, %56 : vector<8x32xf32>
    %cst_31 = arith.constant 9.99999974E-6 : f32
    %58 = vector.broadcast %cst_31 : f32 to vector<8x1xf32>
    %59 = arith.addf %55, %58 : vector<8x1xf32>
    %60 = math.rsqrt %59 : vector<8x1xf32>
    %61 = vector.broadcast %60 : vector<8x1xf32> to vector<8x32xf32>
    %62 = arith.mulf %57, %61 : vector<8x32xf32>
    %63 = vector.broadcast %43 : vector<1x32xf32> to vector<8x32xf32>
    %64 = arith.mulf %62, %63 : vector<8x32xf32>
    %65 = vector.broadcast %44 : vector<1x32xf32> to vector<8x32xf32>
    %66 = arith.addf %64, %65 : vector<8x32xf32>
    %67 = arith.truncf %66 : vector<8x32xf32> to vector<8x32xbf16>
    %c0_32 = arith.constant 0 : index
    %c0_33 = arith.constant 0 : index
    %68 = vector.load %arg14[%c0_32, %c0_33] : memref<32x32xbf16, #tpu.memory_space<vmem>>, vector<32x32xbf16>
    %cst_34 = arith.constant dense<0.000000e+00> : vector<8x32xf32>
    %69 = tpu.matmul %67, %68, %cst_34 {dimension_numbers = #tpu.dot_dimension_numbers<[1], [0], [0], [1], [0, 0, 1, 1], [], []>} : vector<8x32xbf16>, vector<32x32xbf16>, vector<8x32xf32> -> vector<8x32xf32>
    %c0_35 = arith.constant 0 : index
    %c0_36 = arith.constant 0 : index
    %70 = vector.load %arg17[%c0_35, %c0_36] : memref<1x32xf32, #tpu.memory_space<vmem>>, vector<1x32xf32>
    %71 = vector.broadcast %70 : vector<1x32xf32> to vector<8x32xf32>
    %72 = arith.addf %69, %71 : vector<8x32xf32>
    %cst_37 = arith.constant 0.353553385 : f32
    %73 = vector.broadcast %cst_37 : f32 to vector<8x32xf32>
    %74 = arith.mulf %72, %73 : vector<8x32xf32>
    %c0_38 = arith.constant 0 : index
    %c0_39 = arith.constant 0 : index
    %c0_40 = arith.constant 0 : index
    %75 = vector.load %arg33[%c0_38, %c0_39, %c0_40] : memref<4x16x8xbf16, #tpu.memory_space<vmem>>, vector<4x16x8xbf16>
    %c0_41 = arith.constant 0 : index
    %c0_42 = arith.constant 0 : index
    %c0_43 = arith.constant 0 : index
    %76 = vector.load %arg34[%c0_41, %c0_42, %c0_43] : memref<4x16x8xbf16, #tpu.memory_space<vmem>>, vector<4x16x8xbf16>
    %77 = vector.shape_cast %74 : vector<8x32xf32> to vector<8x4x8xf32>
    %78 = tpu.transpose %77, [1, 0, 2] : vector<8x4x8xf32> -> vector<4x8x8xf32>
    %79 = arith.truncf %78 : vector<4x8x8xf32> to vector<4x8x8xbf16>
    "tpu.trace_start"() <{level = 10 : i32, message = "hqd,hkd->hqk"}> : () -> ()
    %cst_44 = arith.constant dense<0.000000e+00> : vector<4x8x16xf32>
    %80 = tpu.matmul %79, %75, %cst_44 {dimension_numbers = #tpu.dot_dimension_numbers<[2], [2], [1], [1], [0, 0, 0, 1, 1, 1], [0], [0]>} : vector<4x8x8xbf16>, vector<4x16x8xbf16>, vector<4x8x16xf32> -> vector<4x8x16xf32>
    "tpu.trace_stop"() : () -> ()
    %cst_45 = arith.constant dense<0xFF800000> : vector<4x8xf32>
    %81 = vector.multi_reduction <maximumf>, %80, %cst_45 [2] : vector<4x8x16xf32> to vector<4x8xf32>
    %82 = vector.shape_cast %81 : vector<4x8xf32> to vector<4x8x1xf32>
    %83 = vector.broadcast %82 : vector<4x8x1xf32> to vector<4x8x16xf32>
    %84 = arith.subf %80, %83 : vector<4x8x16xf32>
    %85 = math.exp %84 : vector<4x8x16xf32>
    %cst_46 = arith.constant dense<0.000000e+00> : vector<4x8xf32>
    %86 = vector.multi_reduction <add>, %85, %cst_46 [2] : vector<4x8x16xf32> to vector<4x8xf32>
    %87 = vector.shape_cast %86 : vector<4x8xf32> to vector<4x8x1xf32>
    %88 = arith.truncf %85 : vector<4x8x16xf32> to vector<4x8x16xbf16>
    "tpu.trace_start"() <{level = 10 : i32, message = "hqk,hkd->hqd"}> : () -> ()
    %cst_47 = arith.constant dense<0.000000e+00> : vector<4x8x8xf32>
    %89 = tpu.matmul %88, %76, %cst_47 {dimension_numbers = #tpu.dot_dimension_numbers<[2], [1], [1], [2], [0, 0, 0, 1, 1, 2], [0], [0]>} : vector<4x8x16xbf16>, vector<4x16x8xbf16>, vector<4x8x8xf32> -> vector<4x8x8xf32>
    "tpu.trace_stop"() : () -> ()
    %90 = tpu.reciprocal %87 {approx = true} : vector<4x8x1xf32> -> vector<4x8x1xf32>
    %91 = vector.broadcast %90 : vector<4x8x1xf32> to vector<4x8x8xf32>
    %92 = arith.mulf %89, %91 : vector<4x8x8xf32>
    %c0_48 = arith.constant 0 : index
    %c0_49 = arith.constant 0 : index
    %93 = vector.load %arg20[%c0_48, %c0_49] : memref<32x32xbf16, #tpu.memory_space<vmem>>, vector<32x32xbf16>
    %94 = vector.shape_cast %93 : vector<32x32xbf16> to vector<4x8x32xbf16>
    %95 = arith.truncf %92 : vector<4x8x8xf32> to vector<4x8x8xbf16>
    "tpu.trace_start"() <{level = 10 : i32, message = "hqd,hde->hqe"}> : () -> ()
    %cst_50 = arith.constant dense<0.000000e+00> : vector<4x8x32xf32>
    %96 = tpu.matmul %95, %94, %cst_50 {dimension_numbers = #tpu.dot_dimension_numbers<[2], [1], [1], [2], [0, 0, 0, 1, 1, 2], [0], [0]>} : vector<4x8x8xbf16>, vector<4x8x32xbf16>, vector<4x8x32xf32> -> vector<4x8x32xf32>
    "tpu.trace_stop"() : () -> ()
    %cst_51 = arith.constant dense<0.000000e+00> : vector<8x32xf32>
    %97 = vector.multi_reduction <add>, %96, %cst_51 [0] : vector<4x8x32xf32> to vector<8x32xf32>
    %c0_52 = arith.constant 0 : index
    %c0_53 = arith.constant 0 : index
    %98 = vector.load %arg21[%c0_52, %c0_53] : memref<1x32xf32, #tpu.memory_space<vmem>>, vector<1x32xf32>
    %99 = vector.broadcast %98 : vector<1x32xf32> to vector<8x32xf32>
    %100 = arith.addf %97, %99 : vector<8x32xf32>
    %101 = arith.addf %66, %100 : vector<8x32xf32>
    %c0_54 = arith.constant 0 : index
    %c0_55 = arith.constant 0 : index
    %102 = vector.load %arg22[%c0_54, %c0_55] : memref<1x32xf32, #tpu.memory_space<vmem>>, vector<1x32xf32>
    %c0_56 = arith.constant 0 : index
    %c0_57 = arith.constant 0 : index
    %103 = vector.load %arg23[%c0_56, %c0_57] : memref<1x32xf32, #tpu.memory_space<vmem>>, vector<1x32xf32>
    %cst_58 = arith.constant dense<0.000000e+00> : vector<8xf32>
    %104 = vector.multi_reduction <add>, %101, %cst_58 [1] : vector<8x32xf32> to vector<8xf32>
    %105 = vector.shape_cast %104 : vector<8xf32> to vector<8x1xf32>
    %cst_59 = arith.constant 3.200000e+01 : f32
    %106 = vector.broadcast %cst_59 : f32 to vector<8x1xf32>
    %107 = arith.divf %105, %106 : vector<8x1xf32>
    %108 = vector.broadcast %107 : vector<8x1xf32> to vector<8x32xf32>
    %109 = arith.subf %101, %108 : vector<8x32xf32>
    %110 = arith.mulf %109, %109 : vector<8x32xf32>
    %cst_60 = arith.constant dense<0.000000e+00> : vector<8xf32>
    %111 = vector.multi_reduction <add>, %110, %cst_60 [1] : vector<8x32xf32> to vector<8xf32>
    %112 = vector.shape_cast %111 : vector<8xf32> to vector<8x1xf32>
    %cst_61 = arith.constant 3.200000e+01 : f32
    %113 = vector.broadcast %cst_61 : f32 to vector<8x1xf32>
    %114 = arith.divf %112, %113 : vector<8x1xf32>
    %115 = vector.broadcast %107 : vector<8x1xf32> to vector<8x32xf32>
    %116 = arith.subf %101, %115 : vector<8x32xf32>
    %cst_62 = arith.constant 9.99999974E-6 : f32
    %117 = vector.broadcast %cst_62 : f32 to vector<8x1xf32>
    %118 = arith.addf %114, %117 : vector<8x1xf32>
    %119 = math.rsqrt %118 : vector<8x1xf32>
    %120 = vector.broadcast %119 : vector<8x1xf32> to vector<8x32xf32>
    %121 = arith.mulf %116, %120 : vector<8x32xf32>
    %122 = vector.broadcast %102 : vector<1x32xf32> to vector<8x32xf32>
    %123 = arith.mulf %121, %122 : vector<8x32xf32>
    %124 = vector.broadcast %103 : vector<1x32xf32> to vector<8x32xf32>
    %125 = arith.addf %123, %124 : vector<8x32xf32>
    %126 = arith.truncf %125 : vector<8x32xf32> to vector<8x32xbf16>
    %c0_63 = arith.constant 0 : index
    %c0_64 = arith.constant 0 : index
    %127 = vector.load %arg24[%c0_63, %c0_64] : memref<32x64xbf16, #tpu.memory_space<vmem>>, vector<32x64xbf16>
    %cst_65 = arith.constant dense<0.000000e+00> : vector<8x64xf32>
    %128 = tpu.matmul %126, %127, %cst_65 {dimension_numbers = #tpu.dot_dimension_numbers<[1], [0], [0], [1], [0, 0, 1, 1], [], []>} : vector<8x32xbf16>, vector<32x64xbf16>, vector<8x64xf32> -> vector<8x64xf32>
    %c0_66 = arith.constant 0 : index
    %c0_67 = arith.constant 0 : index
    %129 = vector.load %arg25[%c0_66, %c0_67] : memref<1x64xf32, #tpu.memory_space<vmem>>, vector<1x64xf32>
    %130 = vector.broadcast %129 : vector<1x64xf32> to vector<8x64xf32>
    %131 = arith.addf %128, %130 : vector<8x64xf32>
    %cst_68 = arith.constant 0.000000e+00 : f32
    %132 = vector.broadcast %cst_68 : f32 to vector<8x64xf32>
    %133 = arith.maximumf %131, %132 : vector<8x64xf32>
    %134 = arith.truncf %133 : vector<8x64xf32> to vector<8x64xbf16>
    %c0_69 = arith.constant 0 : index
    %c0_70 = arith.constant 0 : index
    %135 = vector.load %arg26[%c0_69, %c0_70] : memref<64x32xbf16, #tpu.memory_space<vmem>>, vector<64x32xbf16>
    %cst_71 = arith.constant dense<0.000000e+00> : vector<8x32xf32>
    %136 = tpu.matmul %134, %135, %cst_71 {dimension_numbers = #tpu.dot_dimension_numbers<[1], [0], [0], [1], [0, 0, 1, 1], [], []>} : vector<8x64xbf16>, vector<64x32xbf16>, vector<8x32xf32> -> vector<8x32xf32>
    %c0_72 = arith.constant 0 : index
    %c0_73 = arith.constant 0 : index
    %137 = vector.load %arg27[%c0_72, %c0_73] : memref<1x32xf32, #tpu.memory_space<vmem>>, vector<1x32xf32>
    %138 = vector.broadcast %137 : vector<1x32xf32> to vector<8x32xf32>
    %139 = arith.addf %136, %138 : vector<8x32xf32>
    %140 = arith.addf %125, %139 : vector<8x32xf32>
    %c0_74 = arith.constant 0 : index
    %c0_75 = arith.constant 0 : index
    %141 = vector.load %arg28[%c0_74, %c0_75] : memref<1x32xf32, #tpu.memory_space<vmem>>, vector<1x32xf32>
    %c0_76 = arith.constant 0 : index
    %c0_77 = arith.constant 0 : index
    %142 = vector.load %arg29[%c0_76, %c0_77] : memref<1x32xf32, #tpu.memory_space<vmem>>, vector<1x32xf32>
    %cst_78 = arith.constant dense<0.000000e+00> : vector<8xf32>
    %143 = vector.multi_reduction <add>, %140, %cst_78 [1] : vector<8x32xf32> to vector<8xf32>
    %144 = vector.shape_cast %143 : vector<8xf32> to vector<8x1xf32>
    %cst_79 = arith.constant 3.200000e+01 : f32
    %145 = vector.broadcast %cst_79 : f32 to vector<8x1xf32>
    %146 = arith.divf %144, %145 : vector<8x1xf32>
    %147 = vector.broadcast %146 : vector<8x1xf32> to vector<8x32xf32>
    %148 = arith.subf %140, %147 : vector<8x32xf32>
    %149 = arith.mulf %148, %148 : vector<8x32xf32>
    %cst_80 = arith.constant dense<0.000000e+00> : vector<8xf32>
    %150 = vector.multi_reduction <add>, %149, %cst_80 [1] : vector<8x32xf32> to vector<8xf32>
    %151 = vector.shape_cast %150 : vector<8xf32> to vector<8x1xf32>
    %cst_81 = arith.constant 3.200000e+01 : f32
    %152 = vector.broadcast %cst_81 : f32 to vector<8x1xf32>
    %153 = arith.divf %151, %152 : vector<8x1xf32>
    %154 = vector.broadcast %146 : vector<8x1xf32> to vector<8x32xf32>
    %155 = arith.subf %140, %154 : vector<8x32xf32>
    %cst_82 = arith.constant 9.99999974E-6 : f32
    %156 = vector.broadcast %cst_82 : f32 to vector<8x1xf32>
    %157 = arith.addf %153, %156 : vector<8x1xf32>
    %158 = math.rsqrt %157 : vector<8x1xf32>
    %159 = vector.broadcast %158 : vector<8x1xf32> to vector<8x32xf32>
    %160 = arith.mulf %155, %159 : vector<8x32xf32>
    %161 = vector.broadcast %141 : vector<1x32xf32> to vector<8x32xf32>
    %162 = arith.mulf %160, %161 : vector<8x32xf32>
    %163 = vector.broadcast %142 : vector<1x32xf32> to vector<8x32xf32>
    %164 = arith.addf %162, %163 : vector<8x32xf32>
    %c0_83 = arith.constant 0 : index
    %c0_84 = arith.constant 0 : index
    %c0_85 = arith.constant 0 : index
    %165 = vector.load %arg30[%c0_83, %c0_84, %c0_85] : memref<1x8x32xf32, #tpu.memory_space<vmem>>, vector<1x8x32xf32>
    %166 = vector.shape_cast %165 : vector<1x8x32xf32> to vector<8x32xf32>
    %167 = vector.shape_cast %164 : vector<8x32xf32> to vector<1x8x32xf32>
    tpu.vector_store %arg30[%c0_83, %c0_84, %c0_85], %167 {strides = array<i32>} : memref<1x8x32xf32, #tpu.memory_space<vmem>>, vector<1x8x32xf32>,
    return
  }
  func.func @transform_0(%arg0: i32, %arg1: i32) -> (i32, i32, i32) {
    %c0_i32 = arith.constant 0 : i32
    %c0_i32_0 = arith.constant 0 : i32
    %c0_i32_1 = arith.constant 0 : i32
    return %arg0, %c0_i32, %c0_i32_0 : i32, i32, i32
  }
  func.func @transform_1(%arg0: i32, %arg1: i32) -> (i32, i32, i32) {
    %c0_i32 = arith.constant 0 : i32
    %c0_i32_0 = arith.constant 0 : i32
    %c0_i32_1 = arith.constant 0 : i32
    return %arg0, %c0_i32, %c0_i32_0 : i32, i32, i32
  }
  func.func @transform_2(%arg0: i32, %arg1: i32) -> (i32, i32) {
    %c0_i32 = arith.constant 0 : i32
    %c0_i32_0 = arith.constant 0 : i32
    %c0_i32_1 = arith.constant 0 : i32
    return %c0_i32, %c0_i32_0 : i32, i32
  }
  func.func @transform_3(%arg0: i32, %arg1: i32) -> (i32, i32) {
    %c0_i32 = arith.constant 0 : i32
    %c0_i32_0 = arith.constant 0 : i32
    %c0_i32_1 = arith.constant 0 : i32
    return %c0_i32, %c0_i32_0 : i32, i32
  }
  func.func @transform_4(%arg0: i32, %arg1: i32) -> (i32, i32) {
    %c0_i32 = arith.constant 0 : i32
    %c0_i32_0 = arith.constant 0 : i32
    %c0_i32_1 = arith.constant 0 : i32
    return %c0_i32, %c0_i32_0 : i32, i32
  }
  func.func @transform_5(%arg0: i32, %arg1: i32) -> (i32, i32) {
    %c0_i32 = arith.constant 0 : i32
    %c0_i32_0 = arith.constant 0 : i32
    %c0_i32_1 = arith.constant 0 : i32
    return %c0_i32, %c0_i32_0 : i32, i32
  }
  func.func @transform_6(%arg0: i32, %arg1: i32) -> (i32, i32) {
    %c0_i32 = arith.constant 0 : i32
    %c0_i32_0 = arith.constant 0 : i32
    %c0_i32_1 = arith.constant 0 : i32
    return %c0_i32, %c0_i32_0 : i32, i32
  }
  func.func @transform_7(%arg0: i32, %arg1: i32) -> (i32, i32) {
    %c0_i32 = arith.constant 0 : i32
    %c0_i32_0 = arith.constant 0 : i32
    %c0_i32_1 = arith.constant 0 : i32
    return %c0_i32, %c0_i32_0 : i32, i32
  }
  func.func @transform_8(%arg0: i32, %arg1: i32) -> (i32, i32) {
    %c0_i32 = arith.constant 0 : i32
    %c0_i32_0 = arith.constant 0 : i32
    %c0_i32_1 = arith.constant 0 : i32
    return %c0_i32, %c0_i32_0 : i32, i32
  }
  func.func @transform_9(%arg0: i32, %arg1: i32) -> (i32, i32) {
    %c0_i32 = arith.constant 0 : i32
    %c0_i32_0 = arith.constant 0 : i32
    %c0_i32_1 = arith.constant 0 : i32
    return %c0_i32, %c0_i32_0 : i32, i32
  }
  func.func @transform_10(%arg0: i32, %arg1: i32) -> (i32, i32) {
    %c0_i32 = arith.constant 0 : i32
    %c0_i32_0 = arith.constant 0 : i32
    %c0_i32_1 = arith.constant 0 : i32
    return %c0_i32, %c0_i32_0 : i32, i32
  }
  func.func @transform_11(%arg0: i32, %arg1: i32) -> (i32, i32) {
    %c0_i32 = arith.constant 0 : i32
    %c0_i32_0 = arith.constant 0 : i32
    %c0_i32_1 = arith.constant 0 : i32
    return %c0_i32, %c0_i32_0 : i32, i32
  }
  func.func @transform_12(%arg0: i32, %arg1: i32) -> (i32, i32) {
    %c0_i32 = arith.constant 0 : i32
    %c0_i32_0 = arith.constant 0 : i32
    %c0_i32_1 = arith.constant 0 : i32
    return %c0_i32, %c0_i32_0 : i32, i32
  }
  func.func @transform_13(%arg0: i32, %arg1: i32) -> (i32, i32) {
    %c0_i32 = arith.constant 0 : i32
    %c0_i32_0 = arith.constant 0 : i32
    %c0_i32_1 = arith.constant 0 : i32
    return %c0_i32, %c0_i32_0 : i32, i32
  }
  func.func @transform_14(%arg0: i32, %arg1: i32) -> (i32, i32) {
    %c0_i32 = arith.constant 0 : i32
    %c0_i32_0 = arith.constant 0 : i32
    %c0_i32_1 = arith.constant 0 : i32
    return %c0_i32, %c0_i32_0 : i32, i32
  }
  func.func @transform_15(%arg0: i32, %arg1: i32) -> (i32, i32) {
    %c0_i32 = arith.constant 0 : i32
    %c0_i32_0 = arith.constant 0 : i32
    %c0_i32_1 = arith.constant 0 : i32
    return %c0_i32, %c0_i32_0 : i32, i32
  }
  func.func @transform_16(%arg0: i32, %arg1: i32) -> (i32, i32) {
    %c0_i32 = arith.constant 0 : i32
    %c0_i32_0 = arith.constant 0 : i32
    %c0_i32_1 = arith.constant 0 : i32
    return %c0_i32, %c0_i32_0 : i32, i32
  }
  func.func @transform_17(%arg0: i32, %arg1: i32) -> (i32, i32) {
    %c0_i32 = arith.constant 0 : i32
    %c0_i32_0 = arith.constant 0 : i32
    %c0_i32_1 = arith.constant 0 : i32
    return %c0_i32, %c0_i32_0 : i32, i32
  }
  func.func @transform_18(%arg0: i32, %arg1: i32) -> (i32, i32) {
    %c0_i32 = arith.constant 0 : i32
    %c0_i32_0 = arith.constant 0 : i32
    %c0_i32_1 = arith.constant 0 : i32
    return %c0_i32, %c0_i32_0 : i32, i32
  }
  func.func @transform_19(%arg0: i32, %arg1: i32) -> (i32, i32) {
    %c0_i32 = arith.constant 0 : i32
    %c0_i32_0 = arith.constant 0 : i32
    %c0_i32_1 = arith.constant 0 : i32
    return %c0_i32, %c0_i32_0 : i32, i32
  }
  func.func @transform_20(%arg0: i32, %arg1: i32) -> (i32, i32) {
    %c0_i32 = arith.constant 0 : i32
    %c0_i32_0 = arith.constant 0 : i32
    %c0_i32_1 = arith.constant 0 : i32
    return %c0_i32, %c0_i32_0 : i32, i32
  }
  func.func @transform_21(%arg0: i32, %arg1: i32) -> (i32, i32) {
    %c0_i32 = arith.constant 0 : i32
    %c0_i32_0 = arith.constant 0 : i32
    %c0_i32_1 = arith.constant 0 : i32
    return %c0_i32, %c0_i32_0 : i32, i32
  }
  func.func @transform_22(%arg0: i32, %arg1: i32) -> (i32, i32) {
    %c0_i32 = arith.constant 0 : i32
    %c0_i32_0 = arith.constant 0 : i32
    %c0_i32_1 = arith.constant 0 : i32
    return %c0_i32, %c0_i32_0 : i32, i32
  }
  func.func @transform_23(%arg0: i32, %arg1: i32) -> (i32, i32) {
    %c0_i32 = arith.constant 0 : i32
    %c0_i32_0 = arith.constant 0 : i32
    %c0_i32_1 = arith.constant 0 : i32
    return %c0_i32, %c0_i32_0 : i32, i32
  }
  func.func @transform_24(%arg0: i32, %arg1: i32) -> (i32, i32) {
    %c0_i32 = arith.constant 0 : i32
    %c0_i32_0 = arith.constant 0 : i32
    %c0_i32_1 = arith.constant 0 : i32
    return %c0_i32, %c0_i32_0 : i32, i32
  }
  func.func @transform_25(%arg0: i32, %arg1: i32) -> (i32, i32) {
    %c0_i32 = arith.constant 0 : i32
    %c0_i32_0 = arith.constant 0 : i32
    %c0_i32_1 = arith.constant 0 : i32
    return %c0_i32, %c0_i32_0 : i32, i32
  }
  func.func @transform_26(%arg0: i32, %arg1: i32) -> (i32, i32) {
    %c0_i32 = arith.constant 0 : i32
    %c0_i32_0 = arith.constant 0 : i32
    %c0_i32_1 = arith.constant 0 : i32
    return %c0_i32, %c0_i32_0 : i32, i32
  }
  func.func @transform_27(%arg0: i32, %arg1: i32) -> (i32, i32) {
    %c0_i32 = arith.constant 0 : i32
    %c0_i32_0 = arith.constant 0 : i32
    %c0_i32_1 = arith.constant 0 : i32
    return %c0_i32, %c0_i32_0 : i32, i32
  }
  func.func @transform_28(%arg0: i32, %arg1: i32) -> (i32, i32, i32) {
    %c0_i32 = arith.constant 0 : i32
    %c0_i32_0 = arith.constant 0 : i32
    return %arg0, %arg1, %c0_i32 : i32, i32, i32
  }
}

</mosaic_0001>

<bundles_post_ra>
// kernel: tpu_custom_call.1
= control target key start
LH: loop header
LB: loop body
LE: loop exit
PB: predicated region body
PF: predicated region fallthrough
CT: control target
= control target key end

     0   :  { %s6804_s0 = inlined_call_operand.vmem [shape: f32[2,8,32], index: 0, kind: input, shape index: {}]   ;;  %s6805_s1 = inlined_call_operand.vmem [shape: f32[2,16,32], index: 1, kind: input, shape index: {}]   ;;  %s6806_s2 = inlined_call_operand.hbm [shape: bf16[32,32], index: 2, kind: input, shape index: {}]   ;;  %s6807_s3 = inlined_call_operand.hbm [shape: bf16[32,32], index: 3, kind: input, shape index: {}]   ;;  %s6808_s4 = inlined_call_operand.hbm [shape: bf16[32,32], index: 4, kind: input, shape index: {}]   ;;  %s6809_s5 = inlined_call_operand.hbm [shape: f32[1,32], index: 5, kind: input, shape index: {}]   ;;  %s6810_s6 = inlined_call_operand.hbm [shape: f32[1,32], index: 6, kind: input, shape index: {}]   ;;  %s6811_s7 = inlined_call_operand.hbm [shape: f32[1,32], index: 7, kind: input, shape index: {}]   ;;  %s6812_s8 = inlined_call_operand.hbm [shape: bf16[32,32], index: 8, kind: input, shape index: {}]   ;;  %s6813_s9 = inlined_call_operand.hbm [shape: f32[1,32], index: 9, kind: input, shape index: {}]   ;;  %s6814_s10 = inlined_call_operand.hbm [shape: f32[1,32], index: 10, kind: input, shape index: {}]   ;;  %s6815_s11 = inlined_call_operand.hbm [shape: f32[1,32], index: 11, kind: input, shape index: {}]   ;;  %s6816_s12 = inlined_call_operand.vmem [shape: bf16[32,32], index: 12, kind: input, shape index: {}]   ;;  %s6817_s13 = inlined_call_operand.hbm [shape: bf16[32,32], index: 13, kind: input, shape index: {}]   ;;  %s6818_s14 = inlined_call_operand.hbm [shape: bf16[32,32], index: 14, kind: input, shape index: {}]   ;;  %s6819_s15 = inlined_call_operand.hbm [shape: f32[1,32], index: 15, kind: input, shape index: {}]   ;;  %s6820_s16 = inlined_call_operand.hbm [shape: f32[1,32], index: 16, kind: input, shape index: {}]   ;;  %s6821_s17 = inlined_call_operand.hbm [shape: f32[1,32], index: 17, kind: input, shape index: {}]   ;;  %s6822_s18 = inlined_call_operand.vmem [shape: bf16[32,32], index: 18, kind: input, shape index: {}]   ;;  %s6823_s19 = inlined_call_operand.vmem [shape: f32[1,32], index: 19, kind: input, shape index: {}]   ;;  %s6824_s20 = inlined_call_operand.vmem [shape: f32[1,32], index: 20, kind: input, shape index: {}]   ;;  %s6825_s21 = inlined_call_operand.vmem [shape: f32[1,32], index: 21, kind: input, shape index: {}]   ;;  %s6826_s22 = inlined_call_operand.hbm [shape: bf16[32,64], index: 22, kind: input, shape index: {}]   ;;  %s6827_s23 = inlined_call_operand.vmem [shape: f32[1,64], index: 23, kind: input, shape index: {}]   ;;  %s6828_s24 = inlined_call_operand.vmem [shape: bf16[64,32], index: 24, kind: input, shape index: {}]   ;;  %s6829_s25 = inlined_call_operand.vmem [shape: f32[1,32], index: 25, kind: input, shape index: {}]   ;;  %s6830_s26 = inlined_call_operand.vmem [shape: f32[1,32], index: 26, kind: input, shape index: {}]   ;;  %s6831_s27 = inlined_call_operand.vmem [shape: f32[1,32], index: 27, kind: input, shape index: {}]   ;;  %s6832_s28 = inlined_call_operand.hbm [shape: f32[2,8,32], index: 28, kind: output, shape index: {}]  }
   0x1   :  { %6851 = sst [smem:[#allocation51_spill]] %s6804_s0 }
   0x2   :  { %6852 = sst [smem:[#allocation52_spill]] %s6805_s1 }
   0x3   :  { %6853 = sst [smem:[#allocation53_spill]] %s6806_s2 }
   0x4   :  { %6854 = sst [smem:[#allocation54_spill]] %s6807_s3 }
   0x5   :  { %6855 = sst [smem:[#allocation55_spill]] %s6808_s4 }
   0x6   :  { %6856 = sst [smem:[#allocation56_spill]] %s6809_s5 }
   0x7   :  { %6857 = sst [smem:[#allocation57_spill]] %s6810_s6 }
   0x8   :  { %6858 = sst [smem:[#allocation58_spill]] %s6811_s7 }
   0x9   :  { %6859 = sst [smem:[#allocation59_spill]] %s6812_s8 }
   0xa   :  { %6860 = sst [smem:[#allocation60_spill]] %s6813_s9 }
   0xb   :  { %6861 = sst [smem:[#allocation61_spill]] %s6814_s10 }
   0xc   :  { %6862 = sst [smem:[#allocation62_spill]] %s6815_s11 }
   0xd   :  { %6863 = sst [smem:[#allocation63_spill]] %s6816_s12 }
   0xe   :  { %6864 = sst [smem:[#allocation64_spill]] %s6817_s13 }
   0xf   :  { %6865 = sst [smem:[#allocation65_spill]] %s6818_s14 }
  0x10   :  { %6866 = sst [smem:[#allocation66_spill]] %s6830_s26 }
  0x11   :  { %6867 = sst [smem:[#allocation67_spill]] %s6831_s27 }
  0x12   :  { %6868 = sst [smem:[#allocation68_spill]] %s6832_s28 }
  0x13   :  { %33 = vsyncpa [#allocation7], 0 }
  0x14   :  { %34 = vsyncpa [#allocation10], 0 }
  0x15   :  { %35 = vsyncpa [#allocation13], 0 }
  0x16   :  { %36 = vsyncpa [#allocation16], 0 }
  0x17   :  { %37 = vsyncpa [#allocation19], 0 }
  0x18   :  { %38 = vsyncpa [#allocation22], 0 }
  0x19   :  { %39 = vsyncpa [#allocation25], 0 }
  0x1a   :  { %40 = vsyncpa [#allocation28], 0 }
  0x1b   :  { %41 = vsyncpa [#allocation31], 0 }
  0x1c   :  { %42 = vsyncpa [#allocation8], 0 }
  0x1d   :  { %44 = vsyncpa [#allocation8 + $0x1], 0  ;;  %s6019_s8 = smov 0   ;;  %s6021_s5 = smov 0  }
  0x1e   :  { %s6023_s9 = smov 0   ;;  %s6025_s30 = smov 0  }
  0x1f   :  { %s6027_s3 = smov 0   ;;  %s6029_s6 = smov 0  }
  0x20 LB: > { %6869 = sst [smem:[#allocation43_spill]] %s5826_s8  ;;  %s4575_s10 = sadd.s32 4294967295, %s5846_s6   ;;  %s5846_s6 = sphi %s6029_s6, %s50_s6   ;;  %s5842_s3 = sphi %s6027_s3, %s6914_s3   ;;  %s5838_s30 = sphi %s6025_s30, %s6913_s30   ;;  %s5834_s9 = sphi %s6023_s9, %s6912_s9   ;;  %s5830_s5 = sphi %s6021_s5, %s6916_s5   ;;  %s5826_s8 = sphi %s6019_s8, %s6915_s8  }
  0x21   : > { %6870 = sst [smem:[#allocation44_spill]] %s5834_s9  ;;  %s4576_s0 = sadd.s32 4294967294, %s5846_s6  }
  0x22   : > { %6871 = sst [smem:[#allocation45_spill]] %s5842_s3  ;;  %s62_s11 = sadd.s32 1, %s5842_s3 }
  0x23   : > { %6872 = sst [smem:[#allocation46_spill]] %s5846_s6  ;;  %s669_s29 = sadd.s32 1, %s5834_s9 }
  0x24   : > { %p64_p0 = scmp.ge.s32.totalorder %s62_s11, 2  ;;  %p679_p1 = scmp.ne.s32.totalorder %s5834_s9, %s5830_s5 }
  0x25   : > { %p680_p2 = scmp.eq.s32.totalorder %s4575_s10, 1  ;;  %p685_p3 = scmp.ne.s32.totalorder %s5830_s5, %s5826_s8 }
  0x26   : > { %s6918_s11 = smov (%p64_p0, %s62_s11), 0  ;;  %p686_p5 = scmp.eq.s32.totalorder %s4576_s0, 1 }
  0x27   : > { %6873 = sst [smem:[#allocation47_spill]] %s6918_s11  ;;  %p6059_p4 = por %p680_p2, %p679_p1 }
  0x28   : > { %s664_s7 = ssub.s32 %s5842_s3, %s6918_s11  ;;  %p4577_p6 = scmp.ge.s32.totalorder %s5846_s6, 1 }
  0x29   : > { %s6874_s2 = scalar_select %p6059_p4, 1, 0 }
  0x2a   : > { %p667_p7 = scmp.eq.s32.totalorder %s664_s7, 0  ;;  %p6066_p8 = por %p686_p5, %p685_p3 }
  0x2b   : > { %6875 = sst [smem:[#allocation48_spill]] %s6874_s2  ;;  %p693_p9 = scmp.lt.s32.totalorder %s5846_s6, 3 }
  0x2c   : > { %s6876_s12 = scalar_select %p6066_p8, 1, 0 }
  0x2d   : > { %s6072_s1 = scalar_select %p667_p7, %s5834_s9, %s669_s29  }
  0x2e   : > { %6877 = sst [smem:[#allocation49_spill]] %s6876_s12  ;;  %p6074_p10 = pnand %p4577_p6, %p693_p9 }
  0x2f   : > { %6878 = sst [smem:[#allocation50_spill]] %s6072_s1  ;;  %p6078_p11 = scmp.eq.s32.totalorder %s4575_s10, 0 }
  0x30   : > { %s6879_s4 = scalar_select %p6074_p10, 1, 0 }
  0x31   : > { %s6880_s8 = scalar_select %p6078_p11, 1, 0 }
  0x32   : > { %p5095_p12 = pneg %p6074_p10  ;;  %s5848_s0 = smov [#allocation9]  }
  0x33   : > { %s718_s7 = sshll.u32 %s5848_s0, 4  ;;  %s5849_s29 = smov [#allocation12]   ;;  %s719_s7 = int_to_ptr.vmem [resolvable:$true] %s718_s7 }
  0x34   : > { %p6086_p13 = pnand %p6078_p11, %p5095_p12  ;;  %s745_s3 = sshll.u32 %s5849_s29, 4  ;;  %s746_s3 = int_to_ptr.vmem [resolvable:$true] %s745_s3 }
  0x35   : > { %s5329_s1 = scalar_lea.vmem %s719_s7, 256  ;;  %p5337_p5 = scmp.lt.s32.totalorder %s719_s7, %s719_s7 }
  0x36   : > { %p6092_p0 = pneg %p6086_p13  ;;  %p5330_p1 = scmp.ne.s32.totalorder %s719_s7, %s5329_s1 }
  0x37   : > { %p5338_p6 = scmp.lt.s32.totalorder %s5329_s1, %s5329_s1 }
  0x38   : > { %p5332_p2 = pnand %p5330_p1, %p6092_p0 }
  0x39   : > { %p5339_p7 = por %p5338_p6, %p5337_p5 }
  0x3a   : > { %p5333_p3 = pneg %p5332_p2 }
  0x3c   : > { %p5340_p9 = pnand %p5339_p7, %p5333_p3 }
  0x3e   : > { %5343 = shalt.err (!%p5340_p9)
}
  0x3f   : > { %s6844_s0 = smov 64   ;;  %s5851_s29 = smov 4  }
  0x40   : > { %s6883_s6 = sld [smem:[#allocation54_spill]]  ;;  %s5355_s28 = scalar_lea.vmem %s746_s3, 16 }
  0x41   : > { %p5356_p12 = scmp.ne.s32.totalorder %s746_s3, %s5355_s28  ;;  %s5362_s1 = scalar_lea.vmem %s746_s3, 32 }
  0x42   : > { %p5363_p3 = scmp.lt.s32.totalorder %s746_s3, %s746_s3  ;;  %p5364_p5 = scmp.lt.s32.totalorder %s5362_s1, %s5355_s28 }
  0x43   : > { %p5358_p1 = pnand %p5356_p12, %p6092_p0 }
  0x44   : > { %p5365_p6 = por %p5364_p5, %p5363_p3 }
  0x45   : > { %p5359_p2 = pneg %p5358_p1 }
  0x46   : > { %5101 = dma.hbm_to_vmem [thread:$0]  (!%p6086_p13), %s6883_s6, 256, %s719_s7, [#allocation10], %s6844_s0, %s6844_s0, %s5851_s29  }
  0x47   : > { %p5366_p7 = pnand %p5365_p6, %p5359_p2 }
  0x49   : > { %5369 = shalt.err (!%p5366_p7)
}
  0x4a   : > { %s6884_s2 = sld [smem:[#allocation56_spill]]  ;;  %s5852_s9 = smov [#allocation15]  }
  0x4b   : > { %s767_s6 = sshll.u32 %s5852_s9, 4  ;;  %s5853_s12 = smov [#allocation18]   ;;  %s768_s6 = int_to_ptr.vmem [resolvable:$true] %s767_s6 }
  0x4c   : > { %s791_s7 = sshll.u32 %s5853_s12, 4  ;;  %s5381_s0 = scalar_lea.vmem %s768_s6, 16  ;;  %s792_s7 = int_to_ptr.vmem [resolvable:$true] %s791_s7 }
  0x4d   : > { %p5382_p9 = scmp.ne.s32.totalorder %s768_s6, %s5381_s0  ;;  %s5388_s28 = scalar_lea.vmem %s768_s6, 32 }
  0x4e   : > { %p5389_p2 = scmp.lt.s32.totalorder %s768_s6, %s768_s6  ;;  %p5390_p3 = scmp.lt.s32.totalorder %s5388_s28, %s5381_s0 }
  0x4f   : > { %p5384_p12 = pnand %p5382_p9, %p6092_p0 }
  0x50   : > { %5107 = dma.hbm_to_vmem [thread:$0]  (!%p6086_p13), %s6884_s2, 16, %s746_s3, [#allocation13]  }
  0x51   : > { %p5385_p1 = pneg %p5384_p12  ;;  %p5391_p5 = por %p5390_p3, %p5389_p2 }
  0x53   : > { %p5392_p6 = pnand %p5391_p5, %p5385_p1 }
  0x55   : > { %5395 = shalt.err (!%p5392_p6)
}
  0x56   : > { %s6885_s3 = sld [smem:[#allocation58_spill]]  ;;  %s5407_s2 = scalar_lea.vmem %s792_s7, 16 }
  0x57   : > { %p5408_p7 = scmp.ne.s32.totalorder %s792_s7, %s5407_s2  ;;  %s5414_s1 = scalar_lea.vmem %s792_s7, 32 }
  0x58   : > { %p5415_p12 = scmp.lt.s32.totalorder %s792_s7, %s792_s7  ;;  %p5416_p4 = scmp.lt.s32.totalorder %s5414_s1, %s5407_s2 }
  0x59   : > { %p5410_p8 = pnand %p5408_p7, %p6092_p0 }
  0x5a   : > { %p5417_p11 = por %p5416_p4, %p5415_p12 }
  0x5b   : > { %p5411_p9 = pneg %p5410_p8 }
  0x5c   : > { %5113 = dma.hbm_to_vmem [thread:$0]  (!%p6086_p13), %s6885_s3, 16, %s768_s6, [#allocation16]  }
  0x5d   : > { %p5418_p2 = pnand %p5417_p11, %p5411_p9 }
  0x5f   : > { %5421 = shalt.err (!%p5418_p2)
}
  0x60   : > { %s6886_s12 = sld [smem:[#allocation60_spill]]  ;;  %s5854_s6 = smov [#allocation21]  }
  0x61   : > { %s813_s28 = sshll.u32 %s5854_s6, 4  ;;  %s5855_s26 = smov [#allocation24]   ;;  %s814_s28 = int_to_ptr.vmem [resolvable:$true] %s813_s28 }
  0x62   : > { %s839_s27 = sshll.u32 %s5855_s26, 4  ;;  %s5433_s3 = scalar_lea.vmem %s814_s28, 16  ;;  %s840_s27 = int_to_ptr.vmem [resolvable:$true] %s839_s27 }
  0x63   : > { %p5434_p8 = scmp.ne.s32.totalorder %s814_s28, %s5433_s3  ;;  %s5440_s2 = scalar_lea.vmem %s814_s28, 32 }
  0x64   : > { %p5441_p4 = scmp.lt.s32.totalorder %s814_s28, %s814_s28  ;;  %p5442_p11 = scmp.lt.s32.totalorder %s5440_s2, %s5433_s3 }
  0x65   : > { %p5436_p1 = pnand %p5434_p8, %p6092_p0 }
  0x66   : > { %5119 = dma.hbm_to_vmem [thread:$0]  (!%p6086_p13), %s6886_s12, 16, %s792_s7, [#allocation19]  }
  0x67   : > { %p5437_p3 = pneg %p5436_p1  ;;  %p5443_p5 = por %p5442_p11, %p5441_p4 }
  0x69   : > { %p5444_p6 = pnand %p5443_p5, %p5437_p3 }
  0x6b   : > { %5447 = shalt.err (!%p5444_p6)
}
  0x6c   : > { %s6887_s0 = sld [smem:[#allocation62_spill]]  ;;  %s5459_s9 = scalar_lea.vmem %s840_s27, 256 }
  0x6d   : > { %p5460_p7 = scmp.ne.s32.totalorder %s840_s27, %s5459_s9  ;;  %p5467_p2 = scmp.lt.s32.totalorder %s840_s27, %s840_s27 }
  0x6e   : > { %p5468_p8 = scmp.lt.s32.totalorder %s5459_s9, %s5459_s9 }
  0x6f   : > { %p5462_p9 = pnand %p5460_p7, %p6092_p0 }
  0x70   : > { %p5469_p1 = por %p5468_p8, %p5467_p2 }
  0x71   : > { %p5463_p12 = pneg %p5462_p9 }
  0x72   : > { %5125 = dma.hbm_to_vmem [thread:$0]  (!%p6086_p13), %s6887_s0, 16, %s814_s28, [#allocation22]  }
  0x73   : > { %p5470_p10 = pnand %p5469_p1, %p5463_p12 }
  0x75   : > { %5473 = shalt.err (!%p5470_p10)
}
  0x76   : > { %s6888_s12 = smov 64   ;;  %s6889_s14 = sld [smem:[#allocation65_spill]] }
  0x77   : > { %s5856_s28 = smov [#allocation27]  }
  0x78   : > { %s864_s3 = sshll.u32 %s5856_s28, 4  ;;  %s865_s3 = int_to_ptr.vmem [resolvable:$true] %s864_s3 }
  0x79   : > { %s5485_s2 = scalar_lea.vmem %s865_s3, 16  ;;  %s5492_s1 = scalar_lea.vmem %s865_s3, 32 }
  0x7a   : > { %p5486_p3 = scmp.ne.s32.totalorder %s865_s3, %s5485_s2  ;;  %p5493_p10 = scmp.lt.s32.totalorder %s865_s3, %s865_s3 }
  0x7b   : > { %p5494_p5 = scmp.lt.s32.totalorder %s5492_s1, %s5485_s2 }
  0x7c   : > { %5131 = dma.hbm_to_vmem [thread:$0]  (!%p6086_p13), %s6889_s14, 256, %s840_s27, [#allocation25], %s6888_s12, %s6888_s12, %s5851_s29  }
  0x7d   : > { %p5488_p4 = pnand %p5486_p3, %p6092_p0  ;;  %p5495_p6 = por %p5494_p5, %p5493_p10 }
  0x7f   : > { %p5489_p11 = pneg %p5488_p4 }
  0x81   : > { %p5496_p7 = pnand %p5495_p6, %p5489_p11 }
  0x83   : > { %5499 = shalt.err (!%p5496_p7)
}
  0x84   : > { %5137 = dma.hbm_to_vmem [thread:$0]  (!%p6086_p13), %s6820_s16, 16, %s865_s3, [#allocation28]  }
  0x85   : > { %s5857_s27 = smov [#allocation6]   ;;  %s5858_s6 = smov [#allocation11]  }
  0x86   : > { %s705_s9 = sshll.u32 %s5857_s27, 4  ;;  %s731_s26 = sshll.u32 %s5858_s6, 4  ;;  %s706_s9 = int_to_ptr.vmem [resolvable:$true] %s705_s9  ;;  %s732_s26 = int_to_ptr.vmem [resolvable:$true] %s731_s26 }
  0x87   : > { %s5511_s28 = scalar_lea.vmem %s706_s9, 256  ;;  %p5519_p8 = scmp.lt.s32.totalorder %s706_s9, %s706_s9 }
  0x88   : > { %p5512_p9 = scmp.ne.s32.totalorder %s706_s9, %s5511_s28  ;;  %p5520_p1 = scmp.lt.s32.totalorder %s5511_s28, %s5511_s28 }
  0x8a   : > { %p5514_p12 = pnand %p5512_p9, %p6092_p0  ;;  %p5521_p3 = por %p5520_p1, %p5519_p8 }
  0x8c   : > { %p5515_p2 = pneg %p5514_p12 }
  0x8e   : > { %p5522_p4 = pnand %p5521_p3, %p5515_p2 }
  0x90   : > { %5525 = shalt.err (!%p5522_p4)
}
  0x91   : > { %s6890_s1 = sld [smem:[#allocation53_spill]]  ;;  %s5537_s7 = scalar_lea.vmem %s732_s26, 256 }
  0x92   : > { %p5538_p11 = scmp.ne.s32.totalorder %s732_s26, %s5537_s7  ;;  %p5545_p6 = scmp.lt.s32.totalorder %s732_s26, %s732_s26 }
  0x93   : > { %p5546_p7 = scmp.lt.s32.totalorder %s5537_s7, %s5537_s7 }
  0x94   : > { %p5540_p10 = pnand %p5538_p11, %p6092_p0 }
  0x95   : > { %p5547_p9 = por %p5546_p7, %p5545_p6 }
  0x96   : > { %p5541_p5 = pneg %p5540_p10 }
  0x97   : > { %5098 = dma.hbm_to_vmem [thread:$0]  (!%p6086_p13), %s6890_s1, 256, %s706_s9, [#allocation7], %s6888_s12, %s6888_s12, %s5851_s29  }
  0x98   : > { %p5548_p12 = pnand %p5547_p9, %p5541_p5 }
  0x9a   : > { %5551 = shalt.err (!%p5548_p12)
}
  0x9b   : > { %s6891_s6 = sld [smem:[#allocation55_spill]]  ;;  %s5859_s9 = smov [#allocation14]  }
  0x9c   : > { %s756_s28 = sshll.u32 %s5859_s9, 4  ;;  %s5860_s3 = smov [#allocation17]   ;;  %s757_s28 = int_to_ptr.vmem [resolvable:$true] %s756_s28 }
  0x9d   : > { %s777_s2 = sshll.u32 %s5860_s3, 4  ;;  %s5563_s1 = scalar_lea.vmem %s757_s28, 16  ;;  %s778_s2 = int_to_ptr.vmem [resolvable:$true] %s777_s2 }
  0x9e   : > { %p5564_p2 = scmp.ne.s32.totalorder %s757_s28, %s5563_s1  ;;  %s5570_s7 = scalar_lea.vmem %s757_s28, 32 }
  0x9f   : > { %p5571_p3 = scmp.lt.s32.totalorder %s757_s28, %s757_s28  ;;  %p5572_p4 = scmp.lt.s32.totalorder %s5570_s7, %s5563_s1 }
  0xa0   : > { %p5566_p8 = pnand %p5564_p2, %p6092_p0 }
  0xa1   : > { %5104 = dma.hbm_to_vmem [thread:$0]  (!%p6086_p13), %s6891_s6, 256, %s732_s26, [#allocation10], %s6888_s12, %s6888_s12, %s5851_s29  }
  0xa2   : > { %p5567_p1 = pneg %p5566_p8  ;;  %p5573_p11 = por %p5572_p4, %p5571_p3 }
  0xa4   : > { %p5574_p10 = pnand %p5573_p11, %p5567_p1 }
  0xa6   : > { %5577 = shalt.err (!%p5574_p10)
}
  0xa7   : > { %s6892_s27 = sld [smem:[#allocation57_spill]]  ;;  %s5589_s6 = scalar_lea.vmem %s778_s2, 256 }
  0xa8   : > { %p5590_p5 = scmp.ne.s32.totalorder %s778_s2, %s5589_s6  ;;  %p5597_p9 = scmp.lt.s32.totalorder %s778_s2, %s778_s2 }
  0xa9   : > { %p5598_p12 = scmp.lt.s32.totalorder %s5589_s6, %s5589_s6 }
  0xaa   : > { %p5592_p6 = pnand %p5590_p5, %p6092_p0 }
  0xab   : > { %p5599_p2 = por %p5598_p12, %p5597_p9 }
  0xac   : > { %p5593_p7 = pneg %p5592_p6 }
  0xad   : > { %5110 = dma.hbm_to_vmem [thread:$0]  (!%p6086_p13), %s6892_s27, 16, %s757_s28, [#allocation13]  }
  0xae   : > { %p5600_p8 = pnand %p5599_p2, %p5593_p7 }
  0xb0   : > { %5603 = shalt.err (!%p5600_p8)
}
  0xb1   : > { %s6893_s1 = sld [smem:[#allocation59_spill]]  ;;  %s5861_s28 = smov [#allocation20]  }
  0xb2   : > { %s802_s7 = sshll.u32 %s5861_s28, 4  ;;  %s5862_s26 = smov [#allocation23]   ;;  %s803_s7 = int_to_ptr.vmem [resolvable:$true] %s802_s7 }
  0xb3   : > { %s826_s0 = sshll.u32 %s5862_s26, 4  ;;  %s5615_s27 = scalar_lea.vmem %s803_s7, 16  ;;  %s827_s0 = int_to_ptr.vmem [resolvable:$true] %s826_s0 }
  0xb4   : > { %p5616_p1 = scmp.ne.s32.totalorder %s803_s7, %s5615_s27  ;;  %s5622_s6 = scalar_lea.vmem %s803_s7, 32 }
  0xb5   : > { %p5623_p11 = scmp.lt.s32.totalorder %s803_s7, %s803_s7  ;;  %p5624_p10 = scmp.lt.s32.totalorder %s5622_s6, %s5615_s27 }
  0xb6   : > { %p5618_p3 = pnand %p5616_p1, %p6092_p0 }
  0xb7   : > { %5116 = dma.hbm_to_vmem [thread:$0]  (!%p6086_p13), %s6893_s1, 256, %s778_s2, [#allocation16], %s6888_s12, %s6888_s12, %s5851_s29  }
  0xb8   : > { %p5619_p4 = pneg %p5618_p3  ;;  %p5625_p5 = por %p5624_p10, %p5623_p11 }
  0xba   : > { %p5626_p6 = pnand %p5625_p5, %p5619_p4 }
  0xbc   : > { %5629 = shalt.err (!%p5626_p6)
}
  0xbd   : > { %s6894_s3 = sld [smem:[#allocation61_spill]]  ;;  %s5641_s1 = scalar_lea.vmem %s827_s0, 256 }
  0xbe   : > { %p5642_p7 = scmp.ne.s32.totalorder %s827_s0, %s5641_s1  ;;  %p5649_p2 = scmp.lt.s32.totalorder %s827_s0, %s827_s0 }
  0xbf   : > { %p5650_p8 = scmp.lt.s32.totalorder %s5641_s1, %s5641_s1 }
  0xc0   : > { %p5644_p9 = pnand %p5642_p7, %p6092_p0 }
  0xc1   : > { %p5651_p1 = por %p5650_p8, %p5649_p2 }
  0xc2   : > { %p5645_p12 = pneg %p5644_p9 }
  0xc3   : > { %5122 = dma.hbm_to_vmem [thread:$0]  (!%p6086_p13), %s6894_s3, 16, %s803_s7, [#allocation19]  }
  0xc4   : > { %p5652_p3 = pnand %p5651_p1, %p5645_p12 }
  0xc6   : > { %5655 = shalt.err (!%p5652_p3)
}
  0xc7   : > { %s6895_s13 = sld [smem:[#allocation64_spill]]  ;;  %s5863_s7 = smov [#allocation26]  }
  0xc8   : > { %s853_s27 = sshll.u32 %s5863_s7, 4  ;;  %s5864_s6 = smov [#allocation29]   ;;  %s854_s27 = int_to_ptr.vmem [resolvable:$true] %s853_s27 }
  0xc9   : > { %s875_s2 = sshll.u32 %s5864_s6, 4  ;;  %s5667_s9 = scalar_lea.vmem %s854_s27, 16  ;;  %s876_s2 = int_to_ptr.vmem [resolvable:$true] %s875_s2 }
  0xca   : > { %p5668_p4 = scmp.ne.s32.totalorder %s854_s27, %s5667_s9  ;;  %s5674_s3 = scalar_lea.vmem %s854_s27, 32 }
  0xcb   : > { %p5675_p5 = scmp.lt.s32.totalorder %s854_s27, %s854_s27  ;;  %p5676_p6 = scmp.lt.s32.totalorder %s5674_s3, %s5667_s9 }
  0xcc   : > { %p5670_p11 = pnand %p5668_p4, %p6092_p0 }
  0xcd   : > { %5128 = dma.hbm_to_vmem [thread:$0]  (!%p6086_p13), %s6895_s13, 256, %s827_s0, [#allocation22], %s6888_s12, %s6888_s12, %s5851_s29  }
  0xce   : > { %p5671_p10 = pneg %p5670_p11  ;;  %p5677_p7 = por %p5676_p6, %p5675_p5 }
  0xd0   : > { %p5678_p9 = pnand %p5677_p7, %p5671_p10 }
  0xd2   : > { %5681 = shalt.err (!%p5678_p9)
}
  0xd3   : > { %5134 = dma.hbm_to_vmem [thread:$0]  (!%p6086_p13), %s6819_s15, 16, %s854_s27, [#allocation25]  }
  0xd4   : > { %s5693_s28 = scalar_lea.vmem %s876_s2, 16  ;;  %s5700_s26 = scalar_lea.vmem %s876_s2, 32 }
  0xd5   : > { %p5694_p12 = scmp.ne.s32.totalorder %s876_s2, %s5693_s28  ;;  %p5701_p1 = scmp.lt.s32.totalorder %s876_s2, %s876_s2 }
  0xd6   : > { %p5702_p3 = scmp.lt.s32.totalorder %s5700_s26, %s5693_s28 }
  0xd7   : > { %p5696_p2 = pnand %p5694_p12, %p6092_p0 }
  0xd8   : > { %p5703_p4 = por %p5702_p3, %p5701_p1 }
  0xd9   : > { %p5697_p8 = pneg %p5696_p2 }
  0xdb   : > { %p5704_p11 = pnand %p5703_p4, %p5697_p8 }
  0xdd   : > { %5707 = shalt.err (!%p5704_p11)
}
  0xde   : > { %5140 = dma.hbm_to_vmem [thread:$0]  (!%p6086_p13), %s6821_s17, 16, %s876_s2, [#allocation28]  }
  0xdf   : > { %s5865_s9 = smov [#allocation30]  }
  0xe0   : > { %s897_s27 = sshll.u32 %s5865_s9, 4  ;;  %s898_s27 = int_to_ptr.vmem [resolvable:$true] %s897_s27 }
  0xe1   : > { %s5719_s3 = scalar_lea.vmem %s898_s27, 256  ;;  %p5727_p7 = scmp.lt.s32.totalorder %s898_s27, %s898_s27 }
  0xe2   : > { %p5720_p10 = scmp.ne.s32.totalorder %s898_s27, %s5719_s3  ;;  %p5728_p9 = scmp.lt.s32.totalorder %s5719_s3, %s5719_s3 }
  0xe4   : > { %p5722_p5 = pnand %p5720_p10, %p6092_p0  ;;  %p5729_p12 = por %p5728_p9, %p5727_p7 }
  0xe6   : > { %p5723_p6 = pneg %p5722_p5 }
  0xe8   : > { %p5730_p2 = pnand %p5729_p12, %p5723_p6 }
  0xea   : > { %5733 = shalt.err (!%p5730_p2)
}
  0xeb   : > { %5143 = dma.hbm_to_vmem [thread:$0]  (!%p6086_p13), %s6826_s22, 256, %s898_s27, [#allocation31], %s6888_s12, %s6888_s12, %s5851_s29  }
  0xec   : > { %p6896_p8 = scmp.ne.s32.totalorder %s6879_s4, 0 }
  0xed   : > { %p6897_p0 = scmp.ne.s32.totalorder (!%p6896_p8), %s6880_s8, 0 }
  0xee   : > { %943 = sbr.rel (%p6896_p8) target bundleno = 3829 (0xef5), region = 132 }
  0xf3   : > { %5785 = dma.done.wait (%p6897_p0), [#allocation7], 256  }
  0xf4   : > { %5787 = vsyncadd (%p6897_p0), [#allocation7], 4294967040 }
  0xf5   : > { %5789 = dma.done.wait (%p6897_p0), [#allocation10], 512  }
  0xf6   : > { %5791 = vsyncadd (%p6897_p0), [#allocation10], 4294966784 }
  0xf7   : > { %5793 = dma.done.wait (%p6897_p0), [#allocation13], 32  }
  0xf8   : > { %5795 = vsyncadd (%p6897_p0), [#allocation13], 4294967264 }
  0xf9   : > { %5797 = dma.done.wait (%p6897_p0), [#allocation16], 272  }
  0xfa   : > { %5799 = vsyncadd (%p6897_p0), [#allocation16], 4294967024 }
  0xfb   : > { %5801 = dma.done.wait (%p6897_p0), [#allocation19], 32  }
  0xfc   : > { %5803 = vsyncadd (%p6897_p0), [#allocation19], 4294967264 }
  0xfd   : > { %5805 = dma.done.wait (%p6897_p0), [#allocation22], 272  }
  0xfe   : > { %5807 = vsyncadd (%p6897_p0), [#allocation22], 4294967024 }
  0xff   : > { %5809 = dma.done.wait (%p6897_p0), [#allocation25], 272  }
 0x100   : > { %5811 = vsyncadd (%p6897_p0), [#allocation25], 4294967024 }
 0x101   : > { %5813 = dma.done.wait (%p6897_p0), [#allocation28], 32  }
 0x102   : > { %5815 = vsyncadd (%p6897_p0), [#allocation28], 4294967264 }
 0x103   : > { %5817 = dma.done.wait (%p6897_p0), [#allocation31], 256  }
 0x104   : > { %5819 = vsyncadd (%p6897_p0), [#allocation31], 4294967040  ;;  %p1081_p13 = scmp.lt.s32.totalorder %s5838_s30, 1  ;;  %v5866_v0 = vmov 0.0   ;;  %vm5867_vm0 = vmmov 0   ;;  %s6898_s29 = sld [smem:[#allocation51_spill]]  ;;  %v1182_v41 = vlaneseq }
 0x105   : > { %4817 = vmatprep.subr.bf16.mxu0 %v5866_v0  ;;  %4821 = vmatprep.mubr.msk.bf16.mxu0 %vm5867_vm0, %v5866_v0  ;;  %v5254_v1 = vld [vmem:[#allocation9 + $0x8] sm:$0xff]   ;;  %v5255_v2 = vld [vmem:[#allocation9] sm:$0xff]   ;;  %s6899_s7 = sld [smem:[#allocation52_spill]]  ;;  %vm1123_vm1 = vcmask 261120   ;;  %v5260_v6 = vld [vmem:[#allocation11 + $0x8] sm:$0xff]   ;;  %s5868_s9 = smov 120  }
 0x106   : > { %s1082_s11 = scalar_select %p1081_p13, %s5838_s30, 1  ;;  %4825 = vmatprep.subr.bf16.mxu1 %v5866_v0  ;;  %4829 = vmatprep.mubr.msk.bf16.mxu1 %vm5867_vm0, %v5866_v0  ;;  %v5256_v5 = vld [vmem:[#allocation23 + $0x8] sm:$0xff]   ;;  %v5257_v7 = vld [vmem:[#allocation23] sm:$0xff]   ;;  %v5259_v12 = vld [vmem:[#allocation6] sm:$0xff]   ;;  %v5871_v39 = vmov 1983009808  }
 0x107   : > { %4818 = vmatpush3.bf16.msra.mxu0 %v5254_v1  ;;  %4826 = vmatpush3.bf16.msra.mxu1 %v5260_v6  ;;  %v5258_v10 = vld [vmem:[#allocation6 + $0x8] sm:$0xff]   ;;  %v5261_v13 = vld [vmem:[#allocation11] sm:$0xff]   ;;  %v4616_v14 = vld [vmem:[#allocation14] ss:$0 sm:$0xff]  ;;  %s5869_s27 = smov 104   ;;  %s5870_s3 = smov 112   ;;  %v1180_v40 = vunpack.c.l.s4 %v5871_v39 }
 0x108   : > { %s4613_s4 = sshll.u32 %s1082_s11, 3  ;;  %s4726_s1 = sshll.u32 %s1082_s11, 4  ;;  %4819 = vmatprep.subr.bf16.mxu0 %v5866_v0  ;;  %4827 = vmatprep.subr.bf16.mxu1 %v5866_v0  ;;  %v5262_v22 = vld [vmem:[#allocation24 + $0x8] sm:$0xff]   ;;  %v4660_v25 = vld [vmem:[#allocation12] ss:$0 sm:$0xff]  ;;  %v5263_v26 = vld [vmem:[#allocation24] sm:$0xff]  }
 0x109   : > { %v4622_v33 = vld [vmem:[#allocation15] ss:$0 sm:$0xff]  ;;  %v5872_v42 = vmov 1934713408   ;;  %v1181_v44 = vunpack.c.0.s8 %v1180_v40  ;;  %v1183_v45 = vshrl.u32 %v1182_v41, 7  ;;  %vm1317_vm2 = vcmask 60416  }
 0x10a   : > { %s1084_s12 = scalar_lea.vmem %s6898_s29, %s4613_s4  ;;  %v1212_v43 = vunpack.c.l.s4 %v5872_v42  ;;  %vm2564_vm3 = vcmask 64512   ;;  %vm2792_vm4 = vcmask 1043456   ;;  %s6900_s11 = sld [smem:[#allocation63_spill]]  ;;  %vm3658_vm5 = vcmask 130048  }
 0x10b   : > { %v6278_v3 = vld [vmem:[%s1084_s12] sm:$0xff]  ;;  %s1089_s6 = scalar_lea.vmem %s6899_s7, %s4726_s1  ;;  %4820 = vmatpush3.bf16.msra.mxu0 %v5255_v2  ;;  %4828 = vmatpush3.bf16.msra.mxu1 %v5261_v13  ;;  %v6333_v49 = vsub.s32 %v1181_v44, %v1183_v45  ;;  %vm4248_vm6 = vcmask 523264   ;;  %s1078_s0 = sand.u32 1, %s5830_s5  }
 0x10c   : > { %v1096_v4 = vpack.c.bf16 %v6278_v3, %v6278_v3  ;;  %4833 = vmatprep.subr.bf16.mxu0 %v5866_v0  ;;  %v1097_v8 = vld [vmem:[%s1089_s6] sm:$0xff]  ;;  %v1098_v9 = vld [vmem:[%s1089_s6 + $0x8] sm:$0xff]  ;;  %4841 = vmatprep.subr.bf16.mxu1 %v5866_v0  ;;  %v1213_v48 = vunpack.c.0.s8 %v1212_v43  ;;  %s4612_s2 = sshll.u32 %s1078_s0, 3  ;;  %s6901_s4 = sld [smem:[#allocation48_spill]] }
 0x10d   : > { %v1099_v11 = vpack.c.bf16 %v1098_v9, %v1097_v8  ;;  %s6902_s29 = sld [smem:[#allocation66_spill]]  ;;  %s4723_s26 = sshll.u32 %s5838_s30, 7 }
 0x10e   : > { %4822 = vmatmul.mubr.msk.bf16.vlgmr.msra.gmra.mxu0 %vm1123_vm1, %v1096_v4  ;;  %4830 = vmatmul.mubr.msk.bf16.vlgmr.msra.gmra.mxu1 %vm1123_vm1, %v1096_v4  ;;  %v6335_v55 = vsub.s32 %v1213_v48, %v1183_v45  ;;  %s6903_s28 = sld [smem:[#allocation67_spill]]  ;;  %s1080_s7 = scalar_lea.vmem [#allocation32], %s4612_s2 }
 0x10f   : > { %4834 = vmatpush3.bf16.msra.mxu0 %v5256_v5  ;;  %4837 = vmatprep.mubr.msk.bf16.mxu0 %vm5867_vm0, %v5866_v0  ;;  %s4338_s6 = sshll.u32 %s1080_s7, 4  ;;  %s4324_s14 = scalar_lea.sflag [#allocation8], %s1078_s0  ;;  %s4339_s6 = int_to_ptr.vmem [resolvable:$true] %s4338_s6 }
 0x110   : > { %4835 = vmatprep.subr.bf16.mxu0 %v5866_v0  ;;  %4845 = vmatprep.mubr.msk.bf16.mxu1 %vm5867_vm0, %v5866_v0  ;;  %s5734_s10 = scalar_lea.vmem %s4339_s6, 128  ;;  %s5873_s8 = smov [#allocation32]  }
 0x111   : > { %4842 = vmatpush3.bf16.msra.mxu1 %v5262_v22  ;;  %p5735_p1 = scmp.ne.s32.totalorder %s4339_s6, %s5734_s10 }
 0x112   : > { %4843 = vmatprep.subr.bf16.mxu1 %v5866_v0  ;;  %p6906_p3 = scmp.ne.s32.totalorder %s6901_s4, 0 }
 0x113   : > { %4836 = vmatpush3.bf16.msra.mxu0 %v5257_v7 }
 0x114   : > { %4849 = vmatprep.subr.bf16.mxu0 %v5866_v0  ;;  %p5736_p4 = pnand %p5735_p1, %p6906_p3 }
 0x115   : > { %4844 = vmatpush3.bf16.msra.mxu1 %v5263_v26 }
 0x116   : > { %4838 = vmatmul.mubr.msk.bf16.vlgmr.msra.gmra.mxu0 %vm1123_vm1, %v1099_v11  ;;  %4857 = vmatprep.subr.bf16.mxu1 %v5866_v0  ;;  %p5737_p11 = pneg %p5736_p4 }
 0x117   : > { %4850 = vmatpush3.bf16.msra.mxu0 %v5258_v10  ;;  %4853 = vmatprep.mubr.msk.bf16.mxu0 %vm5867_vm0, %v5866_v0 }
 0x118   : > { %4851 = vmatprep.subr.bf16.mxu0 %v5866_v0  ;;  %4846 = vmatmul.mubr.msk.bf16.vlgmr.msra.gmra.mxu1 %vm1123_vm1, %v1099_v11 }
 0x119   : > { %4859 = vmatprep.mubr.msk.bf16.mxu1 %vm5867_vm0, %v5866_v0 }
 0x11b   : > { %4852 = vmatpush3.bf16.msra.mxu0 %v5259_v12 }
 0x11c   : > { %4863 = vmatprep.subr.bf16.mxu0 %v5866_v0 }
 0x11e   : > { %4854 = vmatmul.mubr.msk.bf16.vlgmr.msra.gmra.mxu0 %vm1123_vm1, %v1096_v4 }
 0x11f   : > { %4865 = vmatprep.mubr.msk.bf16.mxu0 %vm5867_vm0, %v5866_v0 }
 0x1ce   : > { %v1161_v15 = vpop.f32.mrf.mxu0  ;;  %v1379_v34 = vpop.f32.mrf.mxu1 }
 0x1cf   : > { %v1162_v16 = vadd.f32 %v4616_v14, %v1161_v15  ;;  %v6325_v35 = vadd.f32 %v4622_v33, %v1379_v34 }
 0x1d0   : > { %v4823_v17 = vpop.f32.mrf.mxu0  ;;  %v4831_v36 = vpop.f32.mrf.mxu1 }
 0x1d1   : > { %1168 = vrot.lane.b32.xlu0 %v1162_v16, %s5868_s9  ;;  %1174 = vrot.lane.b32.xlu1 %v1162_v16, %s5869_s27 }
 0x1d2   : > { %v1164_v18 = vpop.f32.mrf.mxu0  ;;  %v1382_v37 = vpop.f32.mrf.mxu1 }
 0x1d4   : > { %v4824_v19 = vpop.f32.mrf.mxu0  ;;  %v4832_v38 = vpop.f32.mrf.mxu1 }
 0x1d5   : > { %1171 = vrot.lane.b32.xlu0 %v1162_v16, %s5870_s3 }
 0x1d6   : > { %v6308_v20 = vpop.f32.mrf.mxu0 }
 0x1d8   : > { %v4839_v21 = vpop.f32.mrf.mxu0 }
 0x1da   : > { %v6310_v23 = vpop.f32.mrf.mxu0 }
 0x1dc   : > { %v4840_v24 = vpop.f32.mrf.mxu0 }
 0x1de   : > { %v2399_v27 = vpop.f32.mrf.mxu0 }
 0x1df   : > { %v2400_v28 = vadd.f32 %v4660_v25, %v2399_v27 }
 0x1e0   : > { %v4855_v29 = vpop.f32.mrf.mxu0 }
 0x1e1   : > { %v6314_v30 = vmul.f32 0.35355338, %v2400_v28 }
 0x1e2   : > { %v2402_v31 = vpop.f32.mrf.mxu0 }
 0x1e3   : > { %2418 = vrot.lane.b32.xlu0 %v6314_v30, %s5870_s3  ;;  %2415 = vrot.lane.b32.xlu1 %v6314_v30, %s5868_s9 }
 0x1e4   : > { %v4856_v32 = vpop.f32.mrf.mxu0 }
 0x1e7   : > { %2421 = vrot.lane.b32.xlu1 %v6314_v30, %s5869_s27  ;;  %1386 = vrot.lane.b32.xlu0 %v6325_v35, %s5868_s9 }
 0x1eb   : > { %1389 = vrot.lane.b32.xlu1 %v6325_v35, %s5870_s3  ;;  %1392 = vrot.lane.b32.xlu0 %v6325_v35, %s5869_s27 }
 0x243   : > { %v1169_v46 = vpop.permute.xlu0 %1168  ;;  %v1175_v47 = vpop.permute.xlu1 %1174 }
 0x244   : > { %v1193_v50 = vcombine.low %v1169_v46, %v1175_v47  ;;  %v1194_v51 = vcombine.high %v1169_v46, %v1175_v47 }
 0x246   : > { %v1201_v56 = vrot.slane %v1193_v50, %v6333_v49  ;;  %v1208_v57 = vrot.slane %v1194_v51, %v6333_v49 }
 0x247   : > { %v1172_v52 = vpop.permute.xlu0 %1171 }
 0x248   : > { %v1177_v53 = vcombine.low %v1162_v16, %v1172_v52  ;;  %v1178_v54 = vcombine.high %v1162_v16, %v1172_v52 }
 0x24a   : > { %v1185_v58 = vrot.slane %v1177_v53, %v6333_v49  ;;  %v1192_v59 = vrot.slane %v1178_v54, %v6333_v49 }
 0x24c   : > { %v1209_v60 = vcombine.low %v1185_v58, %v1201_v56  ;;  %v1210_v61 = vcombine.high %v1185_v58, %v1201_v56  ;;  %v1225_v62 = vcombine.low %v1192_v59, %v1208_v57  ;;  %v1226_v63 = vcombine.high %v1192_v59, %v1208_v57 }
 0x24e   : > { %v1217_v1 = vrot.slane %v1209_v60, %v6335_v55  ;;  %v1224_v2 = vrot.slane %v1210_v61, %v6335_v55  ;;  %v1233_v4 = vrot.slane %v1225_v62, %v6335_v55  ;;  %v1240_v5 = vrot.slane %v1226_v63, %v6335_v55 }
 0x250   : > { %v1245_v6 = vcombine.low %v1217_v1, %v1224_v2  ;;  %v4620_v7 = vcombine.high %v1217_v1, %v1224_v2  ;;  %v1261_v8 = vcombine.low %v1233_v4, %v1240_v5  ;;  %v4621_v9 = vcombine.high %v1233_v4, %v1240_v5 }
 0x252   : > { %v1252_v10 = vrot.slane %v1245_v6, %v6333_v49  ;;  %v1260_v11 = vrot.slane %v4620_v7, %v6333_v49  ;;  %v1268_v12 = vrot.slane %v1261_v8, %v6333_v49  ;;  %v1276_v13 = vrot.slane %v4621_v9, %v6333_v49 }
 0x254   : > { %v1277_v14 = vcombine.low %v1252_v10, %v1260_v11  ;;  %v1278_v15 = vcombine.high %v1252_v10, %v1260_v11  ;;  %v1293_v16 = vcombine.low %v1268_v12, %v1276_v13  ;;  %v1294_v17 = vcombine.high %v1268_v12, %v1276_v13 }
 0x255   : > { %v2416_v18 = vpop.permute.xlu1 %2415  ;;  %v2419_v25 = vpop.permute.xlu0 %2418 }
 0x256   : > { %v1285_v19 = vrot.slane %v1277_v14, %v6335_v55  ;;  %v1292_v21 = vrot.slane %v1278_v15, %v6335_v55  ;;  %v1301_v22 = vrot.slane %v1293_v16, %v6335_v55  ;;  %v1308_v24 = vrot.slane %v1294_v17, %v6335_v55 }
 0x257   : > { %v2424_v31 = vcombine.low %v6314_v30, %v2419_v25  ;;  %v2425_v32 = vcombine.high %v6314_v30, %v2419_v25 }
 0x258   : > { %v1309_v26 = vcombine.low %v1285_v19, %v1301_v22  ;;  %v1310_v27 = vcombine.high %v1285_v19, %v1301_v22  ;;  %v1311_v28 = vcombine.low %v1292_v21, %v1308_v24  ;;  %v1312_v29 = vcombine.high %v1292_v21, %v1308_v24 }
 0x259   : > { %v2422_v33 = vpop.permute.xlu1 %2421  ;;  %v2432_v41 = vrot.slane %v2424_v31, %v6333_v49  ;;  %v2439_v42 = vrot.slane %v2425_v32, %v6333_v49 }
 0x25a   : > { %v1313_v34 = vpack.c.bf16 %v1309_v26, %v1309_v26  ;;  %v1314_v36 = vpack.c.bf16 %v1310_v27, %v1310_v27  ;;  %v1315_v37 = vpack.c.bf16 %v1311_v28, %v1311_v28  ;;  %v1316_v38 = vpack.c.bf16 %v1312_v29, %v1312_v29  ;;  %v1387_v26 = vpop.permute.xlu0 %1386 }
 0x25b   : > { %v2440_v39 = vcombine.low %v2416_v18, %v2422_v33  ;;  %v2441_v40 = vcombine.high %v2416_v18, %v2422_v33 }
 0x25c   : > { %1318 = vst.msk [vmem:[#allocation2] sm:$0xf] %vm1317_vm2, %v1313_v34  ;;  %1319 = vst.msk [vmem:[#allocation2 + $0x4] sm:$0xf] %vm1317_vm2, %v1314_v36 }
 0x25d   : > { %1320 = vst.msk [vmem:[#allocation2 + $0x8] sm:$0xf] %vm1317_vm2, %v1315_v37  ;;  %1321 = vst.msk [vmem:[#allocation2 + $0xc] sm:$0xf] %vm1317_vm2, %v1316_v38  ;;  %v2448_v30 = vrot.slane %v2440_v39, %v6333_v49  ;;  %v2455_v43 = vrot.slane %v2441_v40, %v6333_v49  ;;  %v1390_v27 = vpop.permute.xlu1 %1389 }
 0x25e   : > { %v1395_v28 = vcombine.low %v6325_v35, %v1390_v27  ;;  %v1396_v29 = vcombine.high %v6325_v35, %v1390_v27  ;;  %v1393_v31 = vpop.permute.xlu0 %1392 }
 0x25f   : > { %v2456_v44 = vcombine.low %v2432_v41, %v2448_v30  ;;  %v2457_v45 = vcombine.high %v2432_v41, %v2448_v30  ;;  %v2472_v46 = vcombine.low %v2439_v42, %v2455_v43  ;;  %v2473_v47 = vcombine.high %v2439_v42, %v2455_v43 }
 0x260   : > { %v1411_v32 = vcombine.low %v1387_v26, %v1393_v31  ;;  %v1412_v33 = vcombine.high %v1387_v26, %v1393_v31  ;;  %v1403_v34 = vrot.slane %v1395_v28, %v6333_v49  ;;  %v1410_v36 = vrot.slane %v1396_v29, %v6333_v49 }
 0x261   : > { %v2464_v48 = vrot.slane %v2456_v44, %v6335_v55  ;;  %v2471_v50 = vrot.slane %v2457_v45, %v6335_v55  ;;  %v2480_v51 = vrot.slane %v2472_v46, %v6335_v55  ;;  %v2487_v52 = vrot.slane %v2473_v47, %v6335_v55 }
 0x262   : > { %v1419_v37 = vrot.slane %v1411_v32, %v6333_v49  ;;  %v1426_v38 = vrot.slane %v1412_v33, %v6333_v49 }
 0x263   : > { %v2492_v53 = vcombine.low %v2464_v48, %v2471_v50  ;;  %v4664_v54 = vcombine.high %v2464_v48, %v2471_v50  ;;  %v2508_v56 = vcombine.low %v2480_v51, %v2487_v52  ;;  %v4665_v57 = vcombine.high %v2480_v51, %v2487_v52  ;;  %v2406_v58 = vld [vmem:[#allocation2] sm:$0xf]  ;;  %v2407_v59 = vld [vmem:[#allocation2 + $0x4] sm:$0xf] }
 0x264   : > { %v2569_v60 = vsel %vm2564_vm3, %v2406_v58, 0  ;;  %v2615_v61 = vsel %vm2564_vm3, %v2407_v59, 0  ;;  %v2408_v12 = vld [vmem:[#allocation2 + $0x8] sm:$0xf]  ;;  %v2409_v13 = vld [vmem:[#allocation2 + $0xc] sm:$0xf]  ;;  %v1427_v39 = vcombine.low %v1403_v34, %v1419_v37  ;;  %v1428_v40 = vcombine.high %v1403_v34, %v1419_v37 }
 0x265   : > { %v2499_v62 = vrot.slane %v2492_v53, %v6333_v49  ;;  %v2507_v63 = vrot.slane %v4664_v54, %v6333_v49  ;;  %v2515_v1 = vrot.slane %v2508_v56, %v6333_v49  ;;  %v2523_v2 = vrot.slane %v4665_v57, %v6333_v49  ;;  %4858 = vmatpush3.bf16.xpose.msra.mxu1 %v2569_v60 }
 0x266   : > { %4864 = vmatpush3.bf16.xpose.msra.mxu0 %v2615_v61  ;;  %4869 = vmatprep.subr.bf16.mxu1 %v5866_v0  ;;  %v2661_v18 = vsel %vm2564_vm3, %v2408_v12, 0  ;;  %v2707_v19 = vsel %vm2564_vm3, %v2409_v13, 0  ;;  %v1443_v41 = vcombine.low %v1410_v36, %v1426_v38  ;;  %v1444_v42 = vcombine.high %v1410_v36, %v1426_v38 }
 0x267   : > { %v2524_v4 = vcombine.low %v2499_v62, %v2507_v63  ;;  %v2540_v5 = vcombine.low %v2515_v1, %v2523_v2  ;;  %4875 = vmatprep.subr.bf16.mxu0 %v5866_v0  ;;  %v2525_v6 = vcombine.high %v2499_v62, %v2507_v63  ;;  %v2541_v7 = vcombine.high %v2515_v1, %v2523_v2 }
 0x268   : > { %v1435_v30 = vrot.slane %v1427_v39, %v6335_v55  ;;  %v1442_v43 = vrot.slane %v1428_v40, %v6335_v55  ;;  %v1451_v35 = vrot.slane %v1443_v41, %v6335_v55  ;;  %v1458_v44 = vrot.slane %v1444_v42, %v6335_v55 }
 0x269   : > { %v2532_v8 = vrot.slane %v2524_v4, %v6335_v55  ;;  %v2548_v9 = vrot.slane %v2540_v5, %v6335_v55  ;;  %v2539_v16 = vrot.slane %v2525_v6, %v6335_v55  ;;  %v2555_v17 = vrot.slane %v2541_v7, %v6335_v55 }
 0x26a   : > { %v1463_v45 = vcombine.low %v1435_v30, %v1442_v43  ;;  %v4626_v46 = vcombine.high %v1435_v30, %v1442_v43  ;;  %v1479_v47 = vcombine.low %v1451_v35, %v1458_v44  ;;  %v4627_v48 = vcombine.high %v1451_v35, %v1458_v44 }
 0x26b   : > { %v2556_v10 = vcombine.low %v2532_v8, %v2548_v9  ;;  %v2557_v11 = vcombine.high %v2532_v8, %v2548_v9  ;;  %v2558_v21 = vcombine.low %v2539_v16, %v2555_v17  ;;  %v2559_v22 = vcombine.high %v2539_v16, %v2555_v17  ;;  %v6417_v9 = vpop.f32.mrf.mxu1 }
 0x26c   : > { %v1470_v50 = vrot.slane %v1463_v45, %v6333_v49  ;;  %v1478_v51 = vrot.slane %v4626_v46, %v6333_v49  ;;  %v1486_v52 = vrot.slane %v1479_v47, %v6333_v49  ;;  %v1494_v53 = vrot.slane %v4627_v48, %v6333_v49 }
 0x26d   : > { %v2560_v14 = vpack.c.bf16 %v2556_v10, %v2556_v10  ;;  %v2561_v15 = vpack.c.bf16 %v2557_v11, %v2557_v11  ;;  %v2562_v24 = vpack.c.bf16 %v2558_v21, %v2558_v21  ;;  %v2563_v25 = vpack.c.bf16 %v2559_v22, %v2559_v22  ;;  %v4847_v10 = vpop.f32.mrf.mxu1 }
 0x26e   : > { %v1495_v54 = vcombine.low %v1470_v50, %v1478_v51  ;;  %v1496_v56 = vcombine.high %v1470_v50, %v1478_v51  ;;  %v1511_v57 = vcombine.low %v1486_v52, %v1494_v53  ;;  %v1512_v58 = vcombine.high %v1486_v52, %v1494_v53  ;;  %v2983_v10 = vld [vmem:[#allocation17 + $0x4] sm:$0xf] }
 0x26f   : > { %4860 = vmatmul.mubr.msk.bf16.vlgmr.msra.gmra.mxu1 %vm2564_vm3, %v2560_v14  ;;  %4866 = vmatmul.mubr.msk.bf16.vlgmr.msra.gmra.mxu0 %vm2564_vm3, %v2561_v15  ;;  %v6419_v11 = vpop.f32.mrf.mxu1 }
 0x270   : > { %4870 = vmatpush3.bf16.xpose.msra.mxu1 %v2661_v18  ;;  %4876 = vmatpush3.bf16.xpose.msra.mxu0 %v2707_v19  ;;  %v1503_v59 = vrot.slane %v1495_v54, %v6335_v55  ;;  %v1510_v60 = vrot.slane %v1496_v56, %v6335_v55  ;;  %v1519_v61 = vrot.slane %v1511_v57, %v6335_v55 }
 0x271   : > { %4871 = vmatprep.mubr.msk.bf16.mxu1 %vm5867_vm0, %v5866_v0  ;;  %4877 = vmatprep.mubr.msk.bf16.mxu0 %vm5867_vm0, %v5866_v0  ;;  %v1526_v62 = vrot.slane %v1512_v58, %v6335_v55  ;;  %v4848_v12 = vpop.f32.mrf.mxu1 }
 0x272   : > { %4881 = vmatprep.subr.bf16.mxu1 %v5866_v0  ;;  %4887 = vmatprep.subr.bf16.mxu0 %v5866_v0  ;;  %v1527_v63 = vcombine.low %v1503_v59, %v1519_v61  ;;  %v1528_v1 = vcombine.high %v1503_v59, %v1519_v61  ;;  %v3040_v12 = vsel %vm2792_vm4, %v2983_v10, 0 }
 0x273   : > { %v1529_v2 = vcombine.low %v1510_v60, %v1526_v62  ;;  %v1530_v4 = vcombine.high %v1510_v60, %v1526_v62 }
 0x274   : > { %v1531_v5 = vpack.c.bf16 %v1527_v63, %v1527_v63  ;;  %v1532_v6 = vpack.c.bf16 %v1528_v1, %v1528_v1 }
 0x275   : > { %v1533_v7 = vpack.c.bf16 %v1529_v2, %v1529_v2  ;;  %v1534_v8 = vpack.c.bf16 %v1530_v4, %v1530_v4 }
 0x276   : > { %1535 = vst.msk [vmem:[#allocation3] sm:$0xf] %vm1317_vm2, %v1531_v5  ;;  %1536 = vst.msk [vmem:[#allocation3 + $0x4] sm:$0xf] %vm1317_vm2, %v1532_v6 }
 0x277   : > { %4872 = vmatmul.mubr.msk.bf16.vlgmr.msra.gmra.mxu1 %vm2564_vm3, %v2562_v24  ;;  %4878 = vmatmul.mubr.msk.bf16.vlgmr.msra.gmra.mxu0 %vm2564_vm3, %v2563_v25  ;;  %1537 = vst.msk [vmem:[#allocation3 + $0x8] sm:$0xf] %vm1317_vm2, %v1533_v7  ;;  %1538 = vst.msk [vmem:[#allocation3 + $0xc] sm:$0xf] %vm1317_vm2, %v1534_v8  ;;  %v2982_v7 = vld [vmem:[#allocation17] sm:$0xf] }
 0x278   : > { %4883 = vmatprep.mubr.msk.bf16.mxu1 %vm5867_vm0, %v5866_v0  ;;  %4889 = vmatprep.mubr.msk.bf16.mxu0 %vm5867_vm0, %v5866_v0  ;;  %v2994_v8 = vsel %vm2792_vm4, %v2982_v7, 0 }
 0x27d   : > { %v2410_v13 = vld [vmem:[#allocation3] sm:$0xf]  ;;  %v2411_v14 = vld [vmem:[#allocation3 + $0x4] sm:$0xf] }
 0x27e   : > { %v2794_v15 = vsel %vm2792_vm4, %v2410_v13, 0  ;;  %v2840_v16 = vsel %vm2792_vm4, %v2411_v14, 0  ;;  %v2412_v53 = vld [vmem:[#allocation3 + $0x8] sm:$0xf]  ;;  %v2413_v58 = vld [vmem:[#allocation3 + $0xc] sm:$0xf] }
 0x27f   : > { %4882 = vmatpush3.bf16.msra.mxu1 %v2794_v15  ;;  %4888 = vmatpush3.bf16.msra.mxu0 %v2840_v16  ;;  %v2886_v61 = vsel %vm2792_vm4, %v2412_v53, 0  ;;  %v2932_v62 = vsel %vm2792_vm4, %v2413_v58, 0 }
 0x280   : > { %4893 = vmatprep.subr.bf16.mxu1 %v5866_v0  ;;  %4899 = vmatprep.subr.bf16.mxu0 %v5866_v0 }
 0x32f   : > { %v2605_v17 = vpop.f32.mrf.mxu1  ;;  %v2651_v18 = vpop.f32.mrf.mxu0 }
 0x330   : > { %v2749_v19 = vsel %vm2564_vm3, %v2605_v17, -inf  ;;  %v2752_v21 = vsel %vm2564_vm3, %v2651_v18, -inf }
 0x331   : > { %2750 = vmax.xlane.f32.xlu1 %v2749_v19  ;;  %v4861_v22 = vpop.f32.mrf.mxu1  ;;  %2753 = vmax.xlane.f32.xlu0 %v2752_v21  ;;  %v4867_v24 = vpop.f32.mrf.mxu0  ;;  %v2984_v19 = vld [vmem:[#allocation17 + $0x8] sm:$0xf] }
 0x333   : > { %v2608_v25 = vpop.f32.mrf.mxu1  ;;  %v2654_v26 = vpop.f32.mrf.mxu0 }
 0x334   : > { %v2985_v25 = vld [vmem:[#allocation17 + $0xc] sm:$0xf] }
 0x335   : > { %v4862_v27 = vpop.f32.mrf.mxu1  ;;  %v4868_v28 = vpop.f32.mrf.mxu0 }
 0x337   : > { %v2697_v29 = vpop.f32.mrf.mxu1  ;;  %v2743_v31 = vpop.f32.mrf.mxu0 }
 0x338   : > { %v2755_v32 = vsel %vm2564_vm3, %v2697_v29, -inf  ;;  %v2758_v33 = vsel %vm2564_vm3, %v2743_v31, -inf }
 0x339   : > { %v4873_v34 = vpop.f32.mrf.mxu1  ;;  %2756 = vmax.xlane.f32.xlu0 %v2755_v32  ;;  %2759 = vmax.xlane.f32.xlu1 %v2758_v33  ;;  %v4879_v36 = vpop.f32.mrf.mxu0 }
 0x33a   : > { %v3132_v34 = vsel %vm2792_vm4, %v2985_v25, 0 }
 0x33b   : > { %v2700_v37 = vpop.f32.mrf.mxu1  ;;  %v2746_v38 = vpop.f32.mrf.mxu0 }
 0x33d   : > { %v4874_v39 = vpop.f32.mrf.mxu1  ;;  %v4880_v40 = vpop.f32.mrf.mxu0 }
 0x3ba   : > { %v2751_v41 = vpop.xlane.xlu1 %2750  ;;  %v2754_v42 = vpop.xlane.xlu0 %2753 }
 0x3bb   : > { %v2761_v30 = vsub.f32 %v2605_v17, %v2751_v41  ;;  %v2762_v43 = vsub.f32 %v2651_v18, %v2754_v42 }
 0x3bd   : > { %v2765_v35 = vmul.f32 1.442695, %v2761_v30  ;;  %v2767_v44 = vmul.f32 1.442695, %v2762_v43 }
 0x3bf   : > { %5280 = vpow2.f32 %v2765_v35 }
 0x3c0   : > { %5282 = vpow2.f32 %v2767_v44 }
 0x3c2   : > { %v2757_v45 = vpop.xlane.xlu0 %2756  ;;  %v2760_v46 = vpop.xlane.xlu1 %2759 }
 0x3c3   : > { %v2763_v47 = vsub.f32 %v2697_v29, %v2757_v45  ;;  %v2764_v48 = vsub.f32 %v2743_v31, %v2760_v46  ;;  %v3086_v31 = vsel %vm2792_vm4, %v2984_v19, 0 }
 0x3c5   : > { %v2769_v50 = vmul.f32 1.442695, %v2763_v47  ;;  %v2771_v51 = vmul.f32 1.442695, %v2764_v48 }
 0x3c7   : > { %5284 = vpow2.f32 %v2769_v50 }
 0x3c8   : > { %5286 = vpow2.f32 %v2771_v51 }
 0x3cc   : > { %v5281_v52 = vpop.eup %5280 }
 0x3cd   : > { %v5283_v54 = vpop.eup %5282  ;;  %v2773_v56 = vsel %vm2564_vm3, %v5281_v52, 0.0  ;;  %v2785_v57 = vpack.c.bf16 %v5281_v52, %v5281_v52 }
 0x3ce   : > { %2774 = vadd.xlane.f32.xlu0 %v2773_v56  ;;  %v2776_v59 = vsel %vm2564_vm3, %v5283_v54, 0.0  ;;  %v2786_v60 = vpack.c.bf16 %v5283_v54, %v5283_v54 }
 0x3cf   : > { %2777 = vadd.xlane.f32.xlu1 %v2776_v59  ;;  %4884 = vmatmul.mubr.msk.bf16.vlgmr.msra.gmra.mxu1 %vm2564_vm3, %v2785_v57 }
 0x3d0   : > { %4890 = vmatmul.mubr.msk.bf16.vlgmr.msra.gmra.mxu0 %vm2564_vm3, %v2786_v60  ;;  %4894 = vmatpush3.bf16.msra.mxu1 %v2886_v61 }
 0x3d1   : > { %4900 = vmatpush3.bf16.msra.mxu0 %v2932_v62  ;;  %4895 = vmatprep.mubr.msk.bf16.mxu1 %vm5867_vm0, %v5866_v0 }
 0x3d2   : > { %4901 = vmatprep.mubr.msk.bf16.mxu0 %vm5867_vm0, %v5866_v0  ;;  %4905 = vmatprep.subr.bf16.mxu1 %v5866_v0 }
 0x3d3   : > { %4911 = vmatprep.subr.bf16.mxu0 %v5866_v0 }
 0x3d4   : > { %v5285_v63 = vpop.eup %5284 }
 0x3d5   : > { %v5287_v1 = vpop.eup %5286  ;;  %v2779_v2 = vsel %vm2564_vm3, %v5285_v63, 0.0  ;;  %v2787_v4 = vpack.c.bf16 %v5285_v63, %v5285_v63 }
 0x3d6   : > { %2780 = vadd.xlane.f32.xlu0 %v2779_v2  ;;  %v2782_v5 = vsel %vm2564_vm3, %v5287_v1, 0.0  ;;  %v2788_v6 = vpack.c.bf16 %v5287_v1, %v5287_v1 }
 0x3d7   : > { %2783 = vadd.xlane.f32.xlu1 %v2782_v5  ;;  %4896 = vmatmul.mubr.msk.bf16.vlgmr.msra.gmra.mxu1 %vm2564_vm3, %v2787_v4 }
 0x3d8   : > { %4902 = vmatmul.mubr.msk.bf16.vlgmr.msra.gmra.mxu0 %vm2564_vm3, %v2788_v6  ;;  %4907 = vmatprep.mubr.msk.bf16.mxu1 %vm5867_vm0, %v5866_v0 }
 0x3d9   : > { %4913 = vmatprep.mubr.msk.bf16.mxu0 %vm5867_vm0, %v5866_v0  ;;  %4906 = vmatpush3.bf16.msra.mxu1 %v2994_v8  ;;  %v4678_v8 = vld [vmem:[#allocation18] ss:$0 sm:$0xff] }
 0x3da   : > { %4917 = vmatprep.subr.bf16.mxu1 %v5866_v0  ;;  %4912 = vmatpush3.bf16.msra.mxu0 %v3040_v12 }
 0x3db   : > { %4923 = vmatprep.subr.bf16.mxu0 %v5866_v0 }
 0x457   : > { %v2775_v13 = vpop.xlane.xlu0 %2774 }
 0x458   : > { %v2778_v14 = vpop.xlane.xlu1 %2777  ;;  %5288 = vrcp.f32 %v2775_v13 }
 0x459   : > { %5290 = vrcp.f32 %v2778_v14 }
 0x45f   : > { %v2781_v15 = vpop.xlane.xlu0 %2780 }
 0x460   : > { %v2784_v16 = vpop.xlane.xlu1 %2783  ;;  %5292 = vrcp.f32 %v2781_v15 }
 0x461   : > { %5294 = vrcp.f32 %v2784_v16 }
 0x465   : > { %v5289_v17 = vpop.eup %5288 }
 0x466   : > { %v5291_v21 = vpop.eup %5290 }
 0x46d   : > { %v5293_v39 = vpop.eup %5292 }
 0x46e   : > { %v5295_v41 = vpop.eup %5294 }
 0x48f   : > { %v2830_v18 = vpop.f32.mrf.mxu1 }
 0x490   : > { %v2978_v22 = vmul.f32 %v5289_v17, %v2830_v18  ;;  %v2876_v24 = vpop.f32.mrf.mxu0 }
 0x491   : > { %v2979_v26 = vmul.f32 %v5291_v21, %v2876_v24  ;;  %v4885_v27 = vpop.f32.mrf.mxu1  ;;  %v4628_v21 = vld [vmem:[#allocation27] ss:$0 sm:$0xff] }
 0x492   : > { %v2986_v28 = vpack.c.bf16 %v2978_v22, %v2978_v22  ;;  %v4891_v29 = vpop.f32.mrf.mxu0  ;;  %v1600_v22 = vadd.f32 %v4628_v21, %v6308_v20  ;;  %v1603_v24 = vadd.f32 %v4628_v21, %v6310_v23  ;;  %v5264_v20 = vld [vmem:[%s6900_s11 + $0x8] sm:$0xff]   ;;  %v5265_v23 = vld [vmem:[%s6900_s11] sm:$0xff]  }
 0x493   : > { %v2987_v32 = vpack.c.bf16 %v2979_v26, %v2979_v26  ;;  %v2833_v33 = vpop.f32.mrf.mxu1 }
 0x494   : > { %v2879_v36 = vpop.f32.mrf.mxu0  ;;  %4908 = vmatmul.mubr.msk.bf16.vlgmr.msra.gmra.mxu1 %vm2564_vm3, %v2986_v28 }
 0x495   : > { %4914 = vmatmul.mubr.msk.bf16.vlgmr.msra.gmra.mxu0 %vm2564_vm3, %v2987_v32  ;;  %v4886_v37 = vpop.f32.mrf.mxu1  ;;  %4918 = vmatpush3.bf16.msra.mxu1 %v3086_v31 }
 0x496   : > { %v4892_v38 = vpop.f32.mrf.mxu0  ;;  %4924 = vmatpush3.bf16.msra.mxu0 %v3132_v34  ;;  %4919 = vmatprep.mubr.msk.bf16.mxu1 %vm5867_vm0, %v5866_v0 }
 0x497   : > { %v2922_v40 = vpop.f32.mrf.mxu1  ;;  %4925 = vmatprep.mubr.msk.bf16.mxu0 %vm5867_vm0, %v5866_v0  ;;  %4929 = vmatprep.subr.bf16.mxu1 %v5866_v0 }
 0x498   : > { %v2980_v42 = vmul.f32 %v5293_v39, %v2922_v40  ;;  %v2968_v30 = vpop.f32.mrf.mxu0  ;;  %4937 = vmatprep.subr.bf16.mxu0 %v5866_v0 }
 0x499   : > { %v2981_v43 = vmul.f32 %v5295_v41, %v2968_v30  ;;  %v4897_v35 = vpop.f32.mrf.mxu1 }
 0x49a   : > { %v2988_v44 = vpack.c.bf16 %v2980_v42, %v2980_v42  ;;  %v4903_v45 = vpop.f32.mrf.mxu0 }
 0x49b   : > { %v2989_v46 = vpack.c.bf16 %v2981_v43, %v2981_v43  ;;  %v2925_v47 = vpop.f32.mrf.mxu1 }
 0x49c   : > { %v2971_v48 = vpop.f32.mrf.mxu0  ;;  %4920 = vmatmul.mubr.msk.bf16.vlgmr.msra.gmra.mxu1 %vm2564_vm3, %v2988_v44 }
 0x49d   : > { %4926 = vmatmul.mubr.msk.bf16.vlgmr.msra.gmra.mxu0 %vm2564_vm3, %v2989_v46  ;;  %v4898_v50 = vpop.f32.mrf.mxu1  ;;  %4933 = vmatprep.mubr.msk.bf16.mxu1 %vm5867_vm0, %v5866_v0 }
 0x49e   : > { %v4904_v51 = vpop.f32.mrf.mxu0  ;;  %4939 = vmatprep.mubr.msk.bf16.mxu0 %vm5867_vm0, %v5866_v0  ;;  %4930 = vmatpush3.bf16.msra.mxu1 %v5264_v20 }
 0x49f   : > { %4931 = vmatprep.subr.bf16.mxu1 %v5866_v0 }
 0x4a2   : > { %4932 = vmatpush3.bf16.msra.mxu1 %v5265_v23 }
 0x4a3   : > { %4943 = vmatprep.subr.bf16.mxu1 %v5866_v0 }
 0x554   : > { %v3030_v52 = vpop.f32.mrf.mxu1 }
 0x555   : > { %v3076_v53 = vpop.f32.mrf.mxu0  ;;  %v3174_v58 = vsel %vm1123_vm1, %v3030_v52, 0.0 }
 0x556   : > { %v4909_v54 = vpop.f32.mrf.mxu1  ;;  %v3175_v59 = vsel %vm1123_vm1, %v3076_v53, 0.0 }
 0x557   : > { %v4915_v56 = vpop.f32.mrf.mxu0  ;;  %v3176_v63 = vadd.f32 %v3175_v59, %v3174_v58 }
 0x558   : > { %v3033_v57 = vpop.f32.mrf.mxu1 }
 0x559   : > { %v3079_v60 = vpop.f32.mrf.mxu0 }
 0x55a   : > { %v4910_v61 = vpop.f32.mrf.mxu1 }
 0x55b   : > { %v4916_v62 = vpop.f32.mrf.mxu0 }
 0x55c   : > { %v3122_v1 = vpop.f32.mrf.mxu1 }
 0x55d   : > { %v3177_v2 = vsel %vm1123_vm1, %v3122_v1, 0.0  ;;  %v3168_v4 = vpop.f32.mrf.mxu0 }
 0x55e   : > { %v3178_v5 = vadd.f32 %v3177_v2, %v3176_v63  ;;  %v4921_v6 = vpop.f32.mrf.mxu1  ;;  %v3179_v7 = vsel %vm1123_vm1, %v3168_v4, 0.0 }
 0x55f   : > { %v4927_v10 = vpop.f32.mrf.mxu0 }
 0x560   : > { %v3180_v12 = vadd.f32 %v3179_v7, %v3178_v5  ;;  %v3125_v13 = vpop.f32.mrf.mxu1 }
 0x561   : > { %v3171_v14 = vpop.f32.mrf.mxu0 }
 0x562   : > { %v3188_v15 = vadd.f32 %v4678_v8, %v3180_v12  ;;  %v4922_v16 = vpop.f32.mrf.mxu1 }
 0x563   : > { %v4928_v17 = vpop.f32.mrf.mxu0 }
 0x564   : > { %v3189_v18 = vadd.f32 %v3188_v15, %v6278_v3 }
 0x566   : > { %v3192_v19 = vsel %vm1123_vm1, %v3189_v18, 0.0 }
 0x567   : > { %3193 = vadd.xlane.f32.xlu0 %v3192_v19 }
 0x57d   : > { %1608 = vrot.lane.b32.xlu0 %v1600_v22, %s5868_s9 }
 0x581   : > { %1616 = vrot.lane.b32.xlu0 %v1603_v24, %s5870_s3 }
 0x585   : > { %1622 = vrot.lane.b32.xlu0 %v1603_v24, %s5869_s27 }
 0x5f0   : > { %v3194_v25 = vpop.xlane.xlu0 %3193 }
 0x5f1   : > { %v3196_v26 = vmul.f32 0.03125, %v3194_v25 }
 0x5f3   : > { %v6480_v27 = vsub.f32 %v3189_v18, %v3196_v26 }
 0x5f4   : > { %v1609_v29 = vpop.permute.xlu0 %1608 }
 0x5f5   : > { %v3198_v3 = vmul.f32 %v6480_v27, %v6480_v27 }
 0x5f7   : > { %v3199_v28 = vsel %vm1123_vm1, %v3198_v3, 0.0 }
 0x5f8   : > { %3200 = vadd.xlane.f32.xlu1 %v3199_v28  ;;  %v1617_v31 = vpop.permute.xlu0 %1616 }
 0x5f9   : > { %v1694_v34 = vcombine.low %v1603_v24, %v1617_v31  ;;  %v1695_v36 = vcombine.high %v1603_v24, %v1617_v31 }
 0x5fb   : > { %v1702_v42 = vrot.slane %v1694_v34, %v6333_v49  ;;  %v1709_v30 = vrot.slane %v1695_v36, %v6333_v49 }
 0x5fc   : > { %v1623_v38 = vpop.permute.xlu0 %1622 }
 0x609   : > { %1610 = vrot.lane.b32.xlu1 %v1603_v24, %s5868_s9 }
 0x60d   : > { %1614 = vrot.lane.b32.xlu1 %v1600_v22, %s5870_s3 }
 0x611   : > { %1620 = vrot.lane.b32.xlu1 %v1600_v22, %s5869_s27 }
 0x681   : > { %v3201_v32 = vpop.xlane.xlu1 %3200 }
 0x682   : > { %v3202_v33 = vmul.f32 0.03125, %v3201_v32 }
 0x684   : > { %v3203_v37 = vadd.f32 1e-05, %v3202_v33 }
 0x685   : > { %v1611_v39 = vpop.permute.xlu1 %1610 }
 0x686   : > { %5296 = vrsqrt.f32 %v3203_v37  ;;  %v1710_v40 = vcombine.low %v1611_v39, %v1623_v38  ;;  %v1711_v41 = vcombine.high %v1611_v39, %v1623_v38  ;;  %v4680_v39 = vld [vmem:[#allocation21] ss:$0 sm:$0xff] }
 0x688   : > { %v1718_v43 = vrot.slane %v1710_v40, %v6333_v49  ;;  %v1725_v35 = vrot.slane %v1711_v41, %v6333_v49 }
 0x689   : > { %v1615_v44 = vpop.permute.xlu1 %1614 }
 0x68a   : > { %v1726_v45 = vcombine.low %v1702_v42, %v1718_v43  ;;  %v1727_v46 = vcombine.high %v1702_v42, %v1718_v43  ;;  %v1742_v47 = vcombine.low %v1709_v30, %v1725_v35  ;;  %v1743_v48 = vcombine.high %v1709_v30, %v1725_v35 }
 0x68b   : > { %v1626_v54 = vcombine.low %v1600_v22, %v1615_v44  ;;  %v1627_v56 = vcombine.high %v1600_v22, %v1615_v44  ;;  %v4679_v22 = vld [vmem:[#allocation20] ss:$0 sm:$0xff] }
 0x68c   : > { %v1734_v50 = vrot.slane %v1726_v45, %v6335_v55  ;;  %v1741_v51 = vrot.slane %v1727_v46, %v6335_v55  ;;  %v1750_v52 = vrot.slane %v1742_v47, %v6335_v55  ;;  %v1757_v53 = vrot.slane %v1743_v48, %v6335_v55 }
 0x68d   : > { %v1621_v57 = vpop.permute.xlu1 %1620  ;;  %v1634_v6 = vrot.slane %v1626_v54, %v6333_v49  ;;  %v1641_v7 = vrot.slane %v1627_v56, %v6333_v49 }
 0x68e   : > { %v1830_v58 = vcombine.low %v1734_v50, %v1741_v51  ;;  %v4634_v59 = vcombine.high %v1734_v50, %v1741_v51  ;;  %v1846_v60 = vcombine.low %v1750_v52, %v1757_v53  ;;  %v4635_v61 = vcombine.high %v1750_v52, %v1757_v53 }
 0x68f   : > { %v1642_v62 = vcombine.low %v1609_v29, %v1621_v57  ;;  %v1643_v63 = vcombine.high %v1609_v29, %v1621_v57 }
 0x690   : > { %v1837_v1 = vrot.slane %v1830_v58, %v6333_v49  ;;  %v1845_v2 = vrot.slane %v4634_v59, %v6333_v49  ;;  %v1853_v4 = vrot.slane %v1846_v60, %v6333_v49  ;;  %v1861_v5 = vrot.slane %v4635_v61, %v6333_v49 }
 0x691   : > { %v1650_v8 = vrot.slane %v1642_v62, %v6333_v49  ;;  %v1657_v10 = vrot.slane %v1643_v63, %v6333_v49 }
 0x692   : > { %v1862_v12 = vcombine.low %v1837_v1, %v1845_v2  ;;  %v1863_v13 = vcombine.high %v1837_v1, %v1845_v2  ;;  %v1878_v14 = vcombine.low %v1853_v4, %v1861_v5  ;;  %v1879_v15 = vcombine.high %v1853_v4, %v1861_v5 }
 0x693   : > { %v5297_v16 = vpop.eup %5296  ;;  %v1658_v17 = vcombine.low %v1634_v6, %v1650_v8  ;;  %v1659_v18 = vcombine.high %v1634_v6, %v1650_v8  ;;  %v1674_v19 = vcombine.low %v1641_v7, %v1657_v10  ;;  %v1675_v21 = vcombine.high %v1641_v7, %v1657_v10 }
 0x694   : > { %v3205_v24 = vmul.f32 %v5297_v16, %v6480_v27  ;;  %v1870_v25 = vrot.slane %v1862_v12, %v6335_v55  ;;  %v1877_v26 = vrot.slane %v1863_v13, %v6335_v55  ;;  %v1886_v3 = vrot.slane %v1878_v14, %v6335_v55  ;;  %v4681_v12 = vld [vmem:[#allocation26] ss:$0 sm:$0xff] }
 0x695   : > { %v1893_v28 = vrot.slane %v1879_v15, %v6335_v55  ;;  %v1666_v20 = vrot.slane %v1658_v17, %v6335_v55  ;;  %v1673_v23 = vrot.slane %v1659_v18, %v6335_v55  ;;  %v1682_v29 = vrot.slane %v1674_v19, %v6335_v55  ;;  %v4644_v17 = vld [vmem:[#allocation29] ss:$0 sm:$0xff] }
 0x696   : > { %v1894_v31 = vcombine.low %v1870_v25, %v1886_v3  ;;  %v1895_v32 = vcombine.high %v1870_v25, %v1886_v3  ;;  %v1689_v33 = vrot.slane %v1675_v21, %v6335_v55  ;;  %v3212_v34 = vmul.f32 %v4679_v22, %v3205_v24 }
 0x697   : > { %v1896_v27 = vcombine.low %v1877_v26, %v1893_v28  ;;  %v1897_v36 = vcombine.high %v1877_v26, %v1893_v28  ;;  %v1762_v37 = vcombine.low %v1666_v20, %v1673_v23  ;;  %v4632_v38 = vcombine.high %v1666_v20, %v1673_v23 }
 0x698   : > { %v4728_v40 = vpack.c.bf16 %v1894_v31, %v1894_v31  ;;  %v4730_v41 = vpack.c.bf16 %v1895_v32, %v1895_v32  ;;  %v1778_v42 = vcombine.low %v1682_v29, %v1689_v33  ;;  %v4633_v30 = vcombine.high %v1682_v29, %v1689_v33 }
 0x699   : > { %v4732_v43 = vpack.c.bf16 %v1896_v27, %v1896_v27  ;;  %v4734_v35 = vpack.c.bf16 %v1897_v36, %v1897_v36  ;;  %v1769_v44 = vrot.slane %v1762_v37, %v6333_v49  ;;  %v1777_v45 = vrot.slane %v4632_v38, %v6333_v49 }
 0x69a   : > { %1931 = vst.msk [vmem:[#allocation4 + $0x4] sm:$0xf] %vm1317_vm2, %v4728_v40  ;;  %1933 = vst.msk [vmem:[#allocation4 + $0xc] sm:$0xf] %vm1317_vm2, %v4730_v41  ;;  %v1785_v46 = vrot.slane %v1778_v42, %v6333_v49  ;;  %v1793_v47 = vrot.slane %v4633_v30, %v6333_v49  ;;  %v6527_v48 = vadd.f32 %v4680_v39, %v3212_v34 }
 0x69b   : > { %1935 = vst.msk [vmem:[#allocation4 + $0x14] sm:$0xf] %vm1317_vm2, %v4732_v43  ;;  %1937 = vst.msk [vmem:[#allocation4 + $0x1c] sm:$0xf] %vm1317_vm2, %v4734_v35  ;;  %v1794_v50 = vcombine.low %v1769_v44, %v1777_v45  ;;  %v1795_v51 = vcombine.high %v1769_v44, %v1777_v45  ;;  %v1996_v21 = vadd.f32 %v4644_v17, %v6417_v9 }
 0x69c   : > { %v1810_v52 = vcombine.low %v1785_v46, %v1793_v47  ;;  %v1811_v53 = vcombine.high %v1785_v46, %v1793_v47  ;;  %v3220_v54 = vpack.c.bf16 %v6527_v48, %v6527_v48  ;;  %v1999_v22 = vadd.f32 %v4644_v17, %v6419_v11 }
 0x69d   : > { %v1802_v56 = vrot.slane %v1794_v50, %v6335_v55  ;;  %v1809_v57 = vrot.slane %v1795_v51, %v6335_v55 }
 0x69e   : > { %v1818_v58 = vrot.slane %v1810_v52, %v6335_v55  ;;  %v1825_v59 = vrot.slane %v1811_v53, %v6335_v55  ;;  %4934 = vmatmul.mubr.msk.bf16.vlgmr.msra.gmra.mxu1 %vm1123_vm1, %v3220_v54 }
 0x69f   : > { %4945 = vmatprep.mubr.msk.bf16.mxu1 %vm5867_vm0, %v5866_v0 }
 0x6a0   : > { %v1826_v60 = vcombine.low %v1802_v56, %v1818_v58  ;;  %v1827_v61 = vcombine.high %v1802_v56, %v1818_v58  ;;  %v1828_v62 = vcombine.low %v1809_v57, %v1825_v59  ;;  %v1829_v63 = vcombine.high %v1809_v57, %v1825_v59 }
 0x6a2   : > { %v4727_v1 = vpack.c.bf16 %v1826_v60, %v1826_v60  ;;  %v4729_v2 = vpack.c.bf16 %v1827_v61, %v1827_v61  ;;  %v4731_v4 = vpack.c.bf16 %v1828_v62, %v1828_v62  ;;  %v4733_v5 = vpack.c.bf16 %v1829_v63, %v1829_v63 }
 0x6a4   : > { %1930 = vst.msk [vmem:[#allocation4] sm:$0xf] %vm1317_vm2, %v4727_v1  ;;  %1932 = vst.msk [vmem:[#allocation4 + $0x8] sm:$0xf] %vm1317_vm2, %v4729_v2 }
 0x6a5   : > { %1934 = vst.msk [vmem:[#allocation4 + $0x10] sm:$0xf] %vm1317_vm2, %v4731_v4  ;;  %1936 = vst.msk [vmem:[#allocation4 + $0x18] sm:$0xf] %vm1317_vm2, %v4733_v5 }
 0x6ab   : > { %v5266_v6 = vld [vmem:[#allocation4] sm:$0xff]   ;;  %v5267_v7 = vld [vmem:[#allocation4 + $0x8] sm:$0xff]  }
 0x6ac   : > { %v3463_v8 = vsel %vm2564_vm3, %v5266_v6, 0  ;;  %v3514_v10 = vsel %vm2564_vm3, %v5267_v7, 0 }
 0x6ad   : > { %4938 = vmatpush3.bf16.xpose.msra.mxu0 %v3463_v8  ;;  %4944 = vmatpush3.bf16.xpose.msra.mxu1 %v3514_v10 }
 0x6ae   : > { %4949 = vmatprep.subr.bf16.mxu0 %v5866_v0  ;;  %4955 = vmatprep.subr.bf16.mxu1 %v5866_v0 }
 0x75e   : > { %v3281_v13 = vpop.f32.mrf.mxu1 }
 0x75f   : > { %v3282_v14 = vadd.f32 %v4681_v12, %v3281_v13 }
 0x760   : > { %v4935_v15 = vpop.f32.mrf.mxu1 }
 0x761   : > { %v3287_v16 = vmul.f32 0.35355338, %v3282_v14 }
 0x762   : > { %v3284_v18 = vpop.f32.mrf.mxu1 }
 0x763   : > { %3308 = vrot.lane.b32.xlu0 %v3287_v16, %s5870_s3  ;;  %3305 = vrot.lane.b32.xlu1 %v3287_v16, %s5868_s9 }
 0x764   : > { %v4936_v19 = vpop.f32.mrf.mxu1 }
 0x767   : > { %2004 = vrot.lane.b32.xlu0 %v1996_v21, %s5868_s9  ;;  %3311 = vrot.lane.b32.xlu1 %v3287_v16, %s5869_s27 }
 0x76b   : > { %2010 = vrot.lane.b32.xlu0 %v1996_v21, %s5870_s3  ;;  %2006 = vrot.lane.b32.xlu1 %v1999_v22, %s5868_s9 }
 0x76f   : > { %2016 = vrot.lane.b32.xlu0 %v1996_v21, %s5869_s27  ;;  %2012 = vrot.lane.b32.xlu1 %v1999_v22, %s5870_s3  ;;  %s6904_s3 = sld [smem:[#allocation68_spill]] }
 0x773   : > { %2018 = vrot.lane.b32.xlu1 %v1999_v22, %s5869_s27 }
 0x775   : > { %s6905_s11 = smov %s6904_s3  ;;  %s4336_s13 = scalar_lea.hbm %s6904_s3, %s4723_s26 }
 0x7d5   : > { %v3306_v24 = vpop.permute.xlu1 %3305  ;;  %v3309_v25 = vpop.permute.xlu0 %3308 }
 0x7d6   : > { %v3314_v26 = vcombine.low %v3287_v16, %v3309_v25  ;;  %v3315_v9 = vcombine.high %v3287_v16, %v3309_v25 }
 0x7d8   : > { %v3322_v11 = vrot.slane %v3314_v26, %v6333_v49  ;;  %v3329_v29 = vrot.slane %v3315_v9, %v6333_v49 }
 0x7d9   : > { %v3312_v3 = vpop.permute.xlu1 %3311  ;;  %v2005_v28 = vpop.permute.xlu0 %2004 }
 0x7da   : > { %v3330_v20 = vcombine.low %v3306_v24, %v3312_v3  ;;  %v3331_v23 = vcombine.high %v3306_v24, %v3312_v3 }
 0x7dc   : > { %v3338_v31 = vrot.slane %v3330_v20, %v6333_v49  ;;  %v3345_v32 = vrot.slane %v3331_v23, %v6333_v49 }
 0x7dd   : > { %v2007_v33 = vpop.permute.xlu1 %2006  ;;  %v2011_v34 = vpop.permute.xlu0 %2010 }
 0x7de   : > { %v3346_v27 = vcombine.low %v3322_v11, %v3338_v31  ;;  %v3347_v36 = vcombine.high %v3322_v11, %v3338_v31  ;;  %v3362_v37 = vcombine.low %v3329_v29, %v3345_v32  ;;  %v3363_v38 = vcombine.high %v3329_v29, %v3345_v32 }
 0x7df   : > { %v2022_v39 = vcombine.low %v1996_v21, %v2011_v34  ;;  %v2023_v40 = vcombine.high %v1996_v21, %v2011_v34 }
 0x7e0   : > { %v3354_v41 = vrot.slane %v3346_v27, %v6335_v55  ;;  %v3361_v42 = vrot.slane %v3347_v36, %v6335_v55  ;;  %v3370_v30 = vrot.slane %v3362_v37, %v6335_v55  ;;  %v3377_v43 = vrot.slane %v3363_v38, %v6335_v55 }
 0x7e1   : > { %v2030_v35 = vrot.slane %v2022_v39, %v6333_v49  ;;  %v2037_v44 = vrot.slane %v2023_v40, %v6333_v49  ;;  %v2013_v45 = vpop.permute.xlu1 %2012  ;;  %v2017_v46 = vpop.permute.xlu0 %2016 }
 0x7e2   : > { %v3382_v47 = vcombine.low %v3354_v41, %v3361_v42  ;;  %v4685_v50 = vcombine.high %v3354_v41, %v3361_v42  ;;  %v3398_v51 = vcombine.low %v3370_v30, %v3377_v43  ;;  %v4686_v52 = vcombine.high %v3370_v30, %v3377_v43 }
 0x7e3   : > { %v2090_v53 = vcombine.low %v1999_v22, %v2013_v45  ;;  %v2091_v54 = vcombine.high %v1999_v22, %v2013_v45  ;;  %v2038_v56 = vcombine.low %v2005_v28, %v2017_v46  ;;  %v2039_v57 = vcombine.high %v2005_v28, %v2017_v46 }
 0x7e4   : > { %v6570_v58 = vrot.slane %v3382_v47, %v6333_v49  ;;  %v6573_v59 = vrot.slane %v4685_v50, %v6333_v49  ;;  %v6576_v60 = vrot.slane %v3398_v51, %v6333_v49  ;;  %v6579_v61 = vrot.slane %v4686_v52, %v6333_v49 }
 0x7e5   : > { %v2098_v62 = vrot.slane %v2090_v53, %v6333_v49  ;;  %v2105_v63 = vrot.slane %v2091_v54, %v6333_v49  ;;  %v2046_v1 = vrot.slane %v2038_v56, %v6333_v49  ;;  %v2053_v2 = vrot.slane %v2039_v57, %v6333_v49  ;;  %v2019_v4 = vpop.permute.xlu1 %2018 }
 0x7e6   : > { %v3414_v5 = vcombine.low %v6570_v58, %v6573_v59  ;;  %v3415_v6 = vcombine.high %v6570_v58, %v6573_v59  ;;  %v3430_v7 = vcombine.low %v6576_v60, %v6579_v61  ;;  %v3431_v8 = vcombine.high %v6576_v60, %v6579_v61 }
 0x7e7   : > { %v2054_v10 = vcombine.low %v2030_v35, %v2046_v1  ;;  %v2055_v12 = vcombine.high %v2030_v35, %v2046_v1  ;;  %v2070_v13 = vcombine.low %v2037_v44, %v2053_v2  ;;  %v2071_v14 = vcombine.high %v2037_v44, %v2053_v2 }
 0x7e8   : > { %v2106_v15 = vcombine.low %v2007_v33, %v2019_v4  ;;  %v2107_v16 = vcombine.high %v2007_v33, %v2019_v4  ;;  %v3422_v17 = vrot.slane %v3414_v5, %v6335_v55  ;;  %v3438_v18 = vrot.slane %v3430_v7, %v6335_v55 }
 0x7e9   : > { %v2062_v19 = vrot.slane %v2054_v10, %v6335_v55  ;;  %v2069_v21 = vrot.slane %v2055_v12, %v6335_v55  ;;  %v2078_v22 = vrot.slane %v2070_v13, %v6335_v55  ;;  %v2085_v24 = vrot.slane %v2071_v14, %v6335_v55 }
 0x7ea   : > { %v2114_v25 = vrot.slane %v2106_v15, %v6333_v49  ;;  %v2121_v26 = vrot.slane %v2107_v16, %v6333_v49  ;;  %v6601_v9 = vcombine.low %v3422_v17, %v3438_v18  ;;  %v6603_v3 = vcombine.high %v3422_v17, %v3438_v18  ;;  %v5268_v17 = vld [vmem:[#allocation4 + $0x10] sm:$0xff]   ;;  %v5269_v18 = vld [vmem:[#allocation4 + $0x18] sm:$0xff]  }
 0x7eb   : > { %v2158_v28 = vcombine.low %v2062_v19, %v2069_v21  ;;  %v4648_v20 = vcombine.high %v2062_v19, %v2069_v21  ;;  %v2174_v23 = vcombine.low %v2078_v22, %v2085_v24  ;;  %v4649_v11 = vcombine.high %v2078_v22, %v2085_v24 }
 0x7ec   : > { %v2122_v29 = vcombine.low %v2098_v62, %v2114_v25  ;;  %v2123_v31 = vcombine.high %v2098_v62, %v2114_v25  ;;  %v2138_v32 = vcombine.low %v2105_v63, %v2121_v26  ;;  %v2139_v33 = vcombine.high %v2105_v63, %v2121_v26 }
 0x7ed   : > { %v2165_v34 = vrot.slane %v2158_v28, %v6333_v49  ;;  %v2173_v27 = vrot.slane %v4648_v20, %v6333_v49  ;;  %v2181_v36 = vrot.slane %v2174_v23, %v6333_v49  ;;  %v2189_v37 = vrot.slane %v4649_v11, %v6333_v49 }
 0x7ee   : > { %v2130_v38 = vrot.slane %v2122_v29, %v6335_v55  ;;  %v2137_v39 = vrot.slane %v2123_v31, %v6335_v55  ;;  %v2146_v40 = vrot.slane %v2138_v32, %v6335_v55  ;;  %v2153_v41 = vrot.slane %v2139_v33, %v6335_v55 }
 0x7ef   : > { %v2190_v42 = vcombine.low %v2165_v34, %v2173_v27  ;;  %v2191_v30 = vcombine.high %v2165_v34, %v2173_v27  ;;  %v2206_v43 = vcombine.low %v2181_v36, %v2189_v37  ;;  %v2207_v35 = vcombine.high %v2181_v36, %v2189_v37 }
 0x7f0   : > { %v2226_v44 = vcombine.low %v2130_v38, %v2137_v39  ;;  %v4650_v45 = vcombine.high %v2130_v38, %v2137_v39  ;;  %v2242_v46 = vcombine.low %v2146_v40, %v2153_v41  ;;  %v4651_v47 = vcombine.high %v2146_v40, %v2153_v41 }
 0x7f1   : > { %v2198_v50 = vrot.slane %v2190_v42, %v6335_v55  ;;  %v2205_v51 = vrot.slane %v2191_v30, %v6335_v55  ;;  %v2214_v52 = vrot.slane %v2206_v43, %v6335_v55  ;;  %v2221_v53 = vrot.slane %v2207_v35, %v6335_v55 }
 0x7f2   : > { %v2233_v54 = vrot.slane %v2226_v44, %v6333_v49  ;;  %v2241_v56 = vrot.slane %v4650_v45, %v6333_v49  ;;  %v2249_v57 = vrot.slane %v2242_v46, %v6333_v49  ;;  %v2257_v62 = vrot.slane %v4651_v47, %v6333_v49 }
 0x7f3   : > { %v2222_v63 = vcombine.low %v2198_v50, %v2214_v52  ;;  %v2223_v1 = vcombine.high %v2198_v50, %v2214_v52  ;;  %v2224_v2 = vcombine.low %v2205_v51, %v2221_v53  ;;  %v2225_v4 = vcombine.high %v2205_v51, %v2221_v53 }
 0x7f4   : > { %v2258_v5 = vcombine.low %v2233_v54, %v2241_v56  ;;  %v2259_v7 = vcombine.high %v2233_v54, %v2241_v56  ;;  %v2274_v10 = vcombine.low %v2249_v57, %v2257_v62  ;;  %v2275_v12 = vcombine.high %v2249_v57, %v2257_v62 }
 0x7f5   : > { %v4735_v13 = vpack.c.bf16 %v2222_v63, %v2222_v63  ;;  %v4737_v14 = vpack.c.bf16 %v2223_v1, %v2223_v1  ;;  %v4739_v15 = vpack.c.bf16 %v2224_v2, %v2224_v2  ;;  %v4741_v16 = vpack.c.bf16 %v2225_v4, %v2225_v4 }
 0x7f6   : > { %v2266_v19 = vrot.slane %v2258_v5, %v6335_v55  ;;  %v2273_v21 = vrot.slane %v2259_v7, %v6335_v55  ;;  %v2282_v49 = vrot.slane %v2274_v10, %v6335_v55  ;;  %v2289_v22 = vrot.slane %v2275_v12, %v6335_v55 }
 0x7f7   : > { %2326 = vst.msk [vmem:[#allocation5] sm:$0xf] %vm1317_vm2, %v4735_v13  ;;  %2328 = vst.msk [vmem:[#allocation5 + $0x8] sm:$0xf] %vm1317_vm2, %v4737_v14  ;;  %v3450_v24 = vpack.c.bf16 %v6601_v9, %v6601_v9  ;;  %v3451_v25 = vpack.c.bf16 %v6603_v3, %v6603_v3  ;;  %v3429_v26 = vrot.slane %v3415_v6, %v6335_v55  ;;  %v3565_v9 = vsel %vm2564_vm3, %v5268_v17, 0 }
 0x7f8   : > { %2330 = vst.msk [vmem:[#allocation5 + $0x10] sm:$0xf] %vm1317_vm2, %v4739_v15  ;;  %2332 = vst.msk [vmem:[#allocation5 + $0x18] sm:$0xf] %vm1317_vm2, %v4741_v16  ;;  %v3445_v28 = vrot.slane %v3431_v8, %v6335_v55  ;;  %v2290_v20 = vcombine.low %v2266_v19, %v2282_v49  ;;  %v2291_v23 = vcombine.high %v2266_v19, %v2282_v49  ;;  %v3616_v3 = vsel %vm2564_vm3, %v5269_v18, 0 }
 0x7f9   : > { %v2292_v11 = vcombine.low %v2273_v21, %v2289_v22  ;;  %v2293_v29 = vcombine.high %v2273_v21, %v2289_v22  ;;  %4940 = vmatmul.mubr.msk.bf16.vlgmr.msra.gmra.mxu0 %vm2564_vm3, %v3450_v24  ;;  %4946 = vmatmul.mubr.msk.bf16.vlgmr.msra.gmra.mxu1 %vm2564_vm3, %v3451_v25 }
 0x7fa   : > { %v4736_v31 = vpack.c.bf16 %v2290_v20, %v2290_v20  ;;  %v4738_v58 = vpack.c.bf16 %v2291_v23, %v2291_v23  ;;  %4950 = vmatpush3.bf16.xpose.msra.mxu0 %v3565_v9  ;;  %4956 = vmatpush3.bf16.xpose.msra.mxu1 %v3616_v3  ;;  %v3448_v55 = vcombine.low %v3429_v26, %v3445_v28  ;;  %v3903_v20 = vld [vmem:[%s6822_s18] sm:$0xf]  ;;  %v3904_v23 = vld [vmem:[%s6822_s18 + $0x4] sm:$0xf] }
 0x7fb   : > { %v4740_v59 = vpack.c.bf16 %v2292_v11, %v2292_v11  ;;  %v4742_v6 = vpack.c.bf16 %v2293_v29, %v2293_v29  ;;  %4951 = vmatprep.mubr.msk.bf16.mxu0 %vm5867_vm0, %v5866_v0  ;;  %4957 = vmatprep.mubr.msk.bf16.mxu1 %vm5867_vm0, %v5866_v0  ;;  %v3449_v60 = vcombine.high %v3429_v26, %v3445_v28  ;;  %v3915_v11 = vsel %vm2792_vm4, %v3903_v20, 0 }
 0x7fc   : > { %2327 = vst.msk [vmem:[#allocation5 + $0x4] sm:$0xf] %vm1317_vm2, %v4736_v31  ;;  %2329 = vst.msk [vmem:[#allocation5 + $0xc] sm:$0xf] %vm1317_vm2, %v4738_v58  ;;  %4961 = vmatprep.subr.bf16.mxu0 %v5866_v0  ;;  %4967 = vmatprep.subr.bf16.mxu1 %v5866_v0  ;;  %v3452_v61 = vpack.c.bf16 %v3448_v55, %v3448_v55  ;;  %v3961_v29 = vsel %vm2792_vm4, %v3904_v23, 0 }
 0x7fd   : > { %2331 = vst.msk [vmem:[#allocation5 + $0x14] sm:$0xf] %vm1317_vm2, %v4740_v59  ;;  %2333 = vst.msk [vmem:[#allocation5 + $0x1c] sm:$0xf] %vm1317_vm2, %v4742_v6  ;;  %v3453_v8 = vpack.c.bf16 %v3449_v60, %v3449_v60  ;;  %v3906_v55 = vld [vmem:[%s6822_s18 + $0xc] sm:$0xf] }
 0x801   : > { %4952 = vmatmul.mubr.msk.bf16.vlgmr.msra.gmra.mxu0 %vm2564_vm3, %v3452_v61  ;;  %4958 = vmatmul.mubr.msk.bf16.vlgmr.msra.gmra.mxu1 %vm2564_vm3, %v3453_v8 }
 0x802   : > { %4963 = vmatprep.mubr.msk.bf16.mxu0 %vm5867_vm0, %v5866_v0  ;;  %4969 = vmatprep.mubr.msk.bf16.mxu1 %vm5867_vm0, %v5866_v0 }
 0x803   : > { %v5270_v32 = vld [vmem:[#allocation5] sm:$0xff]   ;;  %v5271_v33 = vld [vmem:[#allocation5 + $0x8] sm:$0xff]  }
 0x804   : > { %4962 = vmatpush3.bf16.msra.mxu0 %v5270_v32  ;;  %4968 = vmatpush3.bf16.msra.mxu1 %v5271_v33  ;;  %v5273_v19 = vld [vmem:[#allocation5 + $0x18] sm:$0xff]   ;;  %v5272_v21 = vld [vmem:[#allocation5 + $0x10] sm:$0xff]   ;;  %v3905_v32 = vld [vmem:[%s6822_s18 + $0x8] sm:$0xf] }
 0x805   : > { %4973 = vmatprep.subr.bf16.mxu0 %v5866_v0  ;;  %4979 = vmatprep.subr.bf16.mxu1 %v5866_v0 }
 0x8b9   : > { %v3499_v34 = vpop.f32.mrf.mxu0  ;;  %v3550_v27 = vpop.f32.mrf.mxu1 }
 0x8ba   : > { %v3662_v36 = vsel %vm3658_vm5, %v3550_v27, -inf  ;;  %v3659_v37 = vsel %vm3658_vm5, %v3499_v34, -inf }
 0x8bb   : > { %3663 = vmax.xlane.f32.xlu1 %v3662_v36  ;;  %v4947_v38 = vpop.f32.mrf.mxu1  ;;  %3660 = vmax.xlane.f32.xlu0 %v3659_v37  ;;  %v4941_v39 = vpop.f32.mrf.mxu0  ;;  %v4053_v37 = vsel %vm2792_vm4, %v3906_v55, 0  ;;  %v5274_v55 = vld [vmem:[#allocation30 + $0x8] sm:$0xff]  }
 0x8bd   : > { %v3502_v40 = vpop.f32.mrf.mxu0  ;;  %v3553_v41 = vpop.f32.mrf.mxu1 }
 0x8be   : > { %v4007_v40 = vsel %vm2792_vm4, %v3905_v32, 0 }
 0x8bf   : > { %v4942_v42 = vpop.f32.mrf.mxu0  ;;  %v4948_v30 = vpop.f32.mrf.mxu1 }
 0x8c1   : > { %v3601_v43 = vpop.f32.mrf.mxu0  ;;  %v3652_v35 = vpop.f32.mrf.mxu1 }
 0x8c2   : > { %v3665_v44 = vsel %vm3658_vm5, %v3601_v43, -inf  ;;  %v3668_v51 = vsel %vm3658_vm5, %v3652_v35, -inf }
 0x8c3   : > { %3666 = vmax.xlane.f32.xlu0 %v3665_v44  ;;  %v4953_v45 = vpop.f32.mrf.mxu0  ;;  %v4959_v46 = vpop.f32.mrf.mxu1 }
 0x8c5   : > { %v3604_v47 = vpop.f32.mrf.mxu0  ;;  %v3655_v50 = vpop.f32.mrf.mxu1 }
 0x8c7   : > { %3669 = vmax.xlane.f32.xlu0 %v3668_v51  ;;  %v4954_v52 = vpop.f32.mrf.mxu0  ;;  %v4960_v53 = vpop.f32.mrf.mxu1 }
 0x944   : > { %v3664_v54 = vpop.xlane.xlu1 %3663  ;;  %v3661_v56 = vpop.xlane.xlu0 %3660 }
 0x945   : > { %v3672_v57 = vsub.f32 %v3550_v27, %v3664_v54  ;;  %v3671_v62 = vsub.f32 %v3499_v34, %v3661_v56 }
 0x947   : > { %v3677_v63 = vmul.f32 1.442695, %v3672_v57  ;;  %v3675_v1 = vmul.f32 1.442695, %v3671_v62 }
 0x949   : > { %5298 = vpow2.f32 %v3677_v63 }
 0x94a   : > { %5300 = vpow2.f32 %v3675_v1 }
 0x94c   : > { %v3667_v2 = vpop.xlane.xlu0 %3666 }
 0x94d   : > { %v3673_v4 = vsub.f32 %v3601_v43, %v3667_v2 }
 0x94f   : > { %v3679_v5 = vmul.f32 1.442695, %v3673_v4 }
 0x950   : > { %v3670_v7 = vpop.xlane.xlu0 %3669 }
 0x951   : > { %5302 = vpow2.f32 %v3679_v5  ;;  %v3674_v10 = vsub.f32 %v3652_v35, %v3670_v7 }
 0x953   : > { %v3681_v12 = vmul.f32 1.442695, %v3674_v10 }
 0x955   : > { %5304 = vpow2.f32 %v3681_v12 }
 0x956   : > { %v5299_v13 = vpop.eup %5298 }
 0x957   : > { %v5301_v14 = vpop.eup %5300  ;;  %v3686_v15 = vsel %vm3658_vm5, %v5299_v13, 0.0  ;;  %v3696_v16 = vpack.c.bf16 %v5299_v13, %v5299_v13 }
 0x958   : > { %v3683_v17 = vsel %vm3658_vm5, %v5301_v14, 0.0  ;;  %3687 = vadd.xlane.f32.xlu0 %v3686_v15  ;;  %v3695_v18 = vpack.c.bf16 %v5301_v14, %v5301_v14 }
 0x959   : > { %3684 = vadd.xlane.f32.xlu1 %v3683_v17  ;;  %4970 = vmatmul.mubr.msk.bf16.vlgmr.msra.gmra.mxu1 %vm3658_vm5, %v3696_v16 }
 0x95a   : > { %4964 = vmatmul.mubr.msk.bf16.vlgmr.msra.gmra.mxu0 %vm3658_vm5, %v3695_v18  ;;  %4980 = vmatpush3.bf16.msra.mxu1 %v5273_v19 }
 0x95b   : > { %4974 = vmatpush3.bf16.msra.mxu0 %v5272_v21  ;;  %4975 = vmatprep.mubr.msk.bf16.mxu0 %vm5867_vm0, %v5866_v0 }
 0x95c   : > { %4981 = vmatprep.mubr.msk.bf16.mxu1 %vm5867_vm0, %v5866_v0  ;;  %4985 = vmatprep.subr.bf16.mxu0 %v5866_v0 }
 0x95d   : > { %4991 = vmatprep.subr.bf16.mxu1 %v5866_v0 }
 0x95e   : > { %v5303_v49 = vpop.eup %5302 }
 0x95f   : > { %v3689_v22 = vsel %vm3658_vm5, %v5303_v49, 0.0  ;;  %v3697_v24 = vpack.c.bf16 %v5303_v49, %v5303_v49 }
 0x960   : > { %3690 = vadd.xlane.f32.xlu1 %v3689_v22 }
 0x962   : > { %v5305_v25 = vpop.eup %5304  ;;  %4976 = vmatmul.mubr.msk.bf16.vlgmr.msra.gmra.mxu0 %vm3658_vm5, %v3697_v24  ;;  %v4707_v24 = vld [vmem:[%s6823_s19] ss:$0 sm:$0xff] }
 0x963   : > { %v3692_v26 = vsel %vm3658_vm5, %v5305_v25, 0.0  ;;  %v3698_v28 = vpack.c.bf16 %v5305_v25, %v5305_v25  ;;  %4987 = vmatprep.mubr.msk.bf16.mxu0 %vm5867_vm0, %v5866_v0  ;;  %4986 = vmatpush3.bf16.msra.mxu0 %v3915_v11 }
 0x964   : > { %3693 = vadd.xlane.f32.xlu0 %v3692_v26  ;;  %4997 = vmatprep.subr.bf16.mxu0 %v5866_v0 }
 0x965   : > { %4982 = vmatmul.mubr.msk.bf16.vlgmr.msra.gmra.mxu1 %vm3658_vm5, %v3698_v28 }
 0x966   : > { %4993 = vmatprep.mubr.msk.bf16.mxu1 %vm5867_vm0, %v5866_v0  ;;  %4992 = vmatpush3.bf16.msra.mxu1 %v3961_v29 }
 0x967   : > { %5003 = vmatprep.subr.bf16.mxu1 %v5866_v0 }
 0x9e1   : > { %v3688_v9 = vpop.xlane.xlu0 %3687 }
 0x9e2   : > { %v3685_v3 = vpop.xlane.xlu1 %3684  ;;  %5306 = vrcp.f32 %v3688_v9 }
 0x9e3   : > { %5308 = vrcp.f32 %v3685_v3 }
 0x9e9   : > { %v3691_v31 = vpop.xlane.xlu1 %3690 }
 0x9ea   : > { %5310 = vrcp.f32 %v3691_v31 }
 0x9ed   : > { %v3694_v58 = vpop.xlane.xlu0 %3693 }
 0x9ee   : > { %5312 = vrcp.f32 %v3694_v58 }
 0x9ef   : > { %v5307_v59 = vpop.eup %5306 }
 0x9f0   : > { %v5309_v60 = vpop.eup %5308 }
 0x9f7   : > { %v5311_v43 = vpop.eup %5310 }
 0x9fb   : > { %v5313_v46 = vpop.eup %5312 }
 0xa19   : > { %v3791_v6 = vpop.f32.mrf.mxu1 }
 0xa1a   : > { %v3742_v61 = vpop.f32.mrf.mxu0  ;;  %v3900_v8 = vmul.f32 %v5307_v59, %v3791_v6 }
 0xa1b   : > { %v3899_v33 = vmul.f32 %v5309_v60, %v3742_v61  ;;  %v4971_v34 = vpop.f32.mrf.mxu1  ;;  %v5275_v60 = vld [vmem:[#allocation30] sm:$0xff]  }
 0xa1c   : > { %v3908_v27 = vpack.c.bf16 %v3900_v8, %v3900_v8  ;;  %v4965_v36 = vpop.f32.mrf.mxu0  ;;  %v5277_v61 = vld [vmem:[%s6828_s24 + $0x10] sm:$0xff]  }
 0xa1d   : > { %v3907_v38 = vpack.c.bf16 %v3899_v33, %v3899_v33  ;;  %v3794_v39 = vpop.f32.mrf.mxu1 }
 0xa1e   : > { %v3745_v41 = vpop.f32.mrf.mxu0  ;;  %4994 = vmatmul.mubr.msk.bf16.vlgmr.msra.gmra.mxu1 %vm2564_vm3, %v3908_v27  ;;  %v4708_v27 = vld [vmem:[%s6824_s20] ss:$0 sm:$0xff] }
 0xa1f   : > { %4988 = vmatmul.mubr.msk.bf16.vlgmr.msra.gmra.mxu0 %vm2564_vm3, %v3907_v38  ;;  %v4972_v42 = vpop.f32.mrf.mxu1  ;;  %5004 = vmatpush3.bf16.msra.mxu1 %v4053_v37  ;;  %v4709_v37 = vld [vmem:[%s6825_s21] ss:$0 sm:$0xff]  ;;  %v5278_v41 = vld [vmem:[%s6828_s24 + $0x8] sm:$0xff]  }
 0xa20   : > { %v4966_v30 = vpop.f32.mrf.mxu0  ;;  %4998 = vmatpush3.bf16.msra.mxu0 %v4007_v40  ;;  %4999 = vmatprep.mubr.msk.bf16.mxu0 %vm5867_vm0, %v5866_v0  ;;  %v5279_v42 = vld [vmem:[%s6828_s24] sm:$0xff]  }
 0xa21   : > { %5005 = vmatprep.mubr.msk.bf16.mxu1 %vm5867_vm0, %v5866_v0  ;;  %5009 = vmatprep.subr.bf16.mxu0 %v5866_v0  ;;  %v4710_v30 = vld [vmem:[%s6827_s23] ss:$0 sm:$0xff] }
 0xa22   : > { %v3840_v35 = vpop.f32.mrf.mxu0  ;;  %5017 = vmatprep.subr.bf16.mxu1 %v5866_v0 }
 0xa23   : > { %v3901_v44 = vmul.f32 %v5311_v43, %v3840_v35 }
 0xa24   : > { %v4977_v45 = vpop.f32.mrf.mxu0 }
 0xa25   : > { %v3909_v47 = vpack.c.bf16 %v3901_v44, %v3901_v44  ;;  %v3889_v50 = vpop.f32.mrf.mxu1 }
 0xa26   : > { %v3843_v51 = vpop.f32.mrf.mxu0  ;;  %v3902_v52 = vmul.f32 %v5313_v46, %v3889_v50 }
 0xa27   : > { %5000 = vmatmul.mubr.msk.bf16.vlgmr.msra.gmra.mxu0 %vm2564_vm3, %v3909_v47  ;;  %v4983_v53 = vpop.f32.mrf.mxu1 }
 0xa28   : > { %v3910_v54 = vpack.c.bf16 %v3902_v52, %v3902_v52  ;;  %v4978_v56 = vpop.f32.mrf.mxu0  ;;  %5013 = vmatprep.mubr.msk.bf16.mxu0 %vm5867_vm0, %v5866_v0  ;;  %5010 = vmatpush3.bf16.msra.mxu0 %v5274_v55 }
 0xa29   : > { %v3892_v57 = vpop.f32.mrf.mxu1  ;;  %5011 = vmatprep.subr.bf16.mxu0 %v5866_v0 }
 0xa2a   : > { %5006 = vmatmul.mubr.msk.bf16.vlgmr.msra.gmra.mxu1 %vm2564_vm3, %v3910_v54 }
 0xa2b   : > { %v4984_v62 = vpop.f32.mrf.mxu1  ;;  %5025 = vmatprep.mubr.msk.bf16.mxu1 %vm5867_vm0, %v5866_v0 }
 0xa2c   : > { %5012 = vmatpush3.bf16.msra.mxu0 %v5275_v60 }
 0xade   : > { %v3997_v63 = vpop.f32.mrf.mxu1 }
 0xadf   : > { %v3951_v1 = vpop.f32.mrf.mxu0  ;;  %v4096_v13 = vsel %vm1123_vm1, %v3997_v63, 0.0 }
 0xae0   : > { %v4995_v2 = vpop.f32.mrf.mxu1  ;;  %v4095_v12 = vsel %vm1123_vm1, %v3951_v1, 0.0 }
 0xae1   : > { %v4989_v4 = vpop.f32.mrf.mxu0  ;;  %v4097_v16 = vadd.f32 %v4096_v13, %v4095_v12 }
 0xae2   : > { %v4000_v5 = vpop.f32.mrf.mxu1 }
 0xae3   : > { %v3954_v7 = vpop.f32.mrf.mxu0 }
 0xae4   : > { %v4996_v10 = vpop.f32.mrf.mxu1 }
 0xae5   : > { %v4990_v14 = vpop.f32.mrf.mxu0 }
 0xae6   : > { %v4720_v14 = vld [vmem:[%s6902_s29] ss:$0 sm:$0xff]  ;;  %s5738_s29 = sshll.u32 %s5873_s8, 4  ;;  %s5739_s29 = int_to_ptr.vmem [resolvable:$false] %s5738_s29 }
 0xae7   : > { %v4043_v15 = vpop.f32.mrf.mxu0  ;;  %s5740_s30 = scalar_lea.vmem %s5739_s29, 256  ;;  %p5741_p10 = scmp.lt.s32.totalorder %s4339_s6, %s5739_s29 }
 0xae8   : > { %v4098_v17 = vsel %vm1123_vm1, %v4043_v15, 0.0  ;;  %p5742_p5 = scmp.lt.s32.totalorder %s5740_s30, %s5734_s10 }
 0xae9   : > { %v5001_v18 = vpop.f32.mrf.mxu0  ;;  %v4099_v19 = vadd.f32 %v4098_v17, %v4097_v16  ;;  %v4721_v16 = vld [vmem:[%s6903_s28] ss:$0 sm:$0xff] }
 0xaea   : > { %v4089_v21 = vpop.f32.mrf.mxu1  ;;  %p5743_p6 = por %p5742_p5, %p5741_p10 }
 0xaeb   : > { %v4046_v49 = vpop.f32.mrf.mxu0  ;;  %v4100_v22 = vsel %vm1123_vm1, %v4089_v21, 0.0 }
 0xaec   : > { %v4101_v25 = vadd.f32 %v4100_v22, %v4099_v19  ;;  %v5007_v26 = vpop.f32.mrf.mxu1  ;;  %p5744_p7 = pnand %p5743_p6, %p5737_p11 }
 0xaed   : > { %v5002_v28 = vpop.f32.mrf.mxu0 }
 0xaee   : > { %v4109_v20 = vadd.f32 %v4707_v24, %v4101_v25  ;;  %v4092_v23 = vpop.f32.mrf.mxu1 }
 0xaf0   : > { %v5008_v11 = vpop.f32.mrf.mxu1  ;;  %v4110_v29 = vadd.f32 %v4109_v20, %v6527_v48  ;;  %v5276_v48 = vld [vmem:[%s6828_s24 + $0x18] sm:$0xff]  }
 0xaf1   : > { %5018 = vmatpush3.bf16.msra.mxu1 %v5276_v48 }
 0xaf2   : > { %v4113_v9 = vsel %vm1123_vm1, %v4110_v29, 0.0  ;;  %5019 = vmatprep.subr.bf16.mxu1 %v5866_v0 }
 0xaf3   : > { %4114 = vadd.xlane.f32.xlu1 %v4113_v9 }
 0xaf5   : > { %5020 = vmatpush3.bf16.msra.mxu1 %v5277_v61 }
 0xaf6   : > { %5021 = vmatprep.subr.bf16.mxu1 %v5866_v0 }
 0xaf9   : > { %5022 = vmatpush3.bf16.msra.mxu1 %v5278_v41 }
 0xafa   : > { %5023 = vmatprep.subr.bf16.mxu1 %v5866_v0  ;;  %v4714_v0 = vld [vmem:[%s6829_s25] ss:$0 sm:$0xff] }
 0xafd   : > { %5024 = vmatpush3.bf16.msra.mxu1 %v5279_v42 }
 0xb7c   : > { %v4115_v3 = vpop.xlane.xlu1 %4114 }
 0xb7d   : > { %v4116_v31 = vmul.f32 0.03125, %v4115_v3 }
 0xb7f   : > { %v4117_v58 = vsub.f32 %v4110_v29, %v4116_v31 }
 0xb81   : > { %v4118_v59 = vmul.f32 %v4117_v58, %v4117_v58 }
 0xb83   : > { %v4119_v6 = vsel %vm1123_vm1, %v4118_v59, 0.0 }
 0xb84   : > { %4120 = vadd.xlane.f32.xlu0 %v4119_v6 }
 0xc0d   : > { %v4121_v8 = vpop.xlane.xlu0 %4120 }
 0xc0e   : > { %v4122_v32 = vmul.f32 0.03125, %v4121_v8 }
 0xc10   : > { %v4123_v33 = vadd.f32 1e-05, %v4122_v32 }
 0xc12   : > { %5314 = vrsqrt.f32 %v4123_v33 }
 0xc1f   : > { %v5315_v34 = vpop.eup %5314 }
 0xc20   : > { %v4125_v36 = vmul.f32 %v5315_v34, %v4117_v58 }
 0xc22   : > { %v4132_v38 = vmul.f32 %v4708_v27, %v4125_v36 }
 0xc24   : > { %v4139_v39 = vadd.f32 %v4709_v37, %v4132_v38 }
 0xc26   : > { %v4140_v40 = vpack.c.bf16 %v4139_v39, %v4139_v39 }
 0xc28   : > { %5014 = vmatmul.mubr.msk.bf16.vlgmr.msra.gmra.mxu0 %vm1123_vm1, %v4140_v40 }
 0xce8   : > { %v4201_v43 = vpop.f32.mrf.mxu0 }
 0xce9   : > { %v4202_v35 = vadd.f32 %v4710_v30, %v4201_v43 }
 0xcea   : > { %v5015_v44 = vpop.f32.mrf.mxu0 }
 0xceb   : > { %v4207_v45 = vmax.f32 %v4202_v35, 0.0 }
 0xcec   : > { %v4204_v46 = vpop.f32.mrf.mxu0 }
 0xced   : > { %v4208_v47 = vpack.c.bf16 %v4207_v45, %v4207_v45 }
 0xcee   : > { %v5016_v50 = vpop.f32.mrf.mxu0 }
 0xcef   : > { %5026 = vmatmul.mubr.msk.bf16.vlgmr.msra.gmra.mxu1 %vm4248_vm6, %v4208_v47 }
 0xdaf   : > { %v4286_v51 = vpop.f32.mrf.mxu1 }
 0xdb0   : > { %v4287_v52 = vadd.f32 %v4714_v0, %v4286_v51 }
 0xdb1   : > { %v5027_v53 = vpop.f32.mrf.mxu1 }
 0xdb2   : > { %v4292_v54 = vadd.f32 %v4287_v52, %v4139_v39 }
 0xdb3   : > { %v4289_v56 = vpop.f32.mrf.mxu1 }
 0xdb4   : > { %v4295_v57 = vsel %vm1123_vm1, %v4292_v54, 0.0 }
 0xdb5   : > { %4296 = vadd.xlane.f32.xlu1 %v4295_v57  ;;  %v5028_v62 = vpop.f32.mrf.mxu1 }
 0xe3e   : > { %v4297_v63 = vpop.xlane.xlu1 %4296 }
 0xe3f   : > { %v4298_v1 = vmul.f32 0.03125, %v4297_v63 }
 0xe41   : > { %v4299_v2 = vsub.f32 %v4292_v54, %v4298_v1 }
 0xe43   : > { %v4300_v4 = vmul.f32 %v4299_v2, %v4299_v2 }
 0xe45   : > { %v4301_v5 = vsel %vm1123_vm1, %v4300_v4, 0.0 }
 0xe46   : > { %4302 = vadd.xlane.f32.xlu0 %v4301_v5 }
 0xecf   : > { %v4303_v7 = vpop.xlane.xlu0 %4302 }
 0xed0   : > { %v4304_v10 = vmul.f32 0.03125, %v4303_v7 }
 0xed2   : > { %v4305_v12 = vadd.f32 1e-05, %v4304_v10 }
 0xed4   : > { %5316 = vrsqrt.f32 %v4305_v12 }
 0xee1   : > { %v5317_v13 = vpop.eup %5316 }
 0xee2   : > { %v4307_v15 = vmul.f32 %v5317_v13, %v4299_v2 }
 0xee4   : > { %v4314_v17 = vmul.f32 %v4720_v14, %v4307_v15 }
 0xee6   : > { %v4321_v18 = vadd.f32 %v4721_v16, %v4314_v17 }
 0xee8   : > { %4322 = vst.msk [vmem:[%s1080_s7] sm:$0xff] %vm1123_vm1, %v4321_v18 }
 0xee9   : > { %5747 = shalt.err (!%p5744_p7)
}
 0xeea   : > { %s5748_s2 = scalar_lea.hbm %s4336_s13, 128  ;;  %s5752_s1 = scalar_lea.hbm %s6905_s11, 256 }
 0xeeb   : > { %p5749_p9 = scmp.ne.s32.totalorder %s4336_s13, %s5748_s2  ;;  %p5753_p8 = scmp.lt.s32.totalorder %s4336_s13, %s6905_s11 }
 0xeec   : > { %p5754_p0 = scmp.lt.s32.totalorder %s5752_s1, %s5748_s2 }
 0xeed   : > { %p5750_p12 = pnand %p5749_p9, %p6906_p3 }
 0xeee   : > { %p5755_p13 = por %p5754_p0, %p5753_p8 }
 0xeef   : > { %p5751_p2 = pneg %p5750_p12 }
 0xef1   : > { %p5756_p1 = pnand %p5755_p13, %p5751_p2 }
 0xef3   : > { %5759 = shalt.err (!%p5756_p1)
}
 0xef4   : > { %5093 = dma.vmem_to_hbm [thread:$0]  (%p6906_p3), %s4339_s6, 128, %s4336_s13, %s4324_s14  }
 0xef5 PF: > { %s6907_s7 = sld [smem:[#allocation46_spill]] }
 0xef6   : > { %s6908_s9 = sld [smem:[#allocation43_spill]] }
 0xef7   : > { %s6909_s27 = sld [smem:[#allocation49_spill]] }
 0xefb   : > { %p5180_p4 = scmp.ge.s32.totalorder %s6907_s7, 2 }
 0xefc   : > { %s4350_s3 = sand.u32 1, %s6908_s9  }
 0xefd   : > { %p6910_p11 = scmp.ne.s32.totalorder %s6909_s27, 0  ;;  %s4351_s10 = scalar_lea.sflag [#allocation8], %s4350_s3 }
 0xeff   : > { %p5145_p10 = pnand %p5180_p4, %p6910_p11 }
 0xf01   : > { %p5146_p5 = pneg %p5145_p10 }
 0xf03   : > { %5821 = dma.done.wait (%p5146_p5), %s4351_s10, 128  }
 0xf04   : > { %5823 = vsyncadd (%p5146_p5), %s4351_s10, 4294967168  ;;  %s50_s6 = sadd.s32 1, %s6907_s7   ;;  %s6911_s29 = sld [smem:[#allocation44_spill]] }
 0xf05   : > { %p47_p6 = scmp.ge.s32.totalorder %s50_s6, 4   ;;  %s6912_s9 = sld [smem:[#allocation50_spill]] }
 0xf06   : > { %s6913_s30 = sld [smem:[#allocation45_spill]]  ;;  %s6915_s8 = smov %s5830_s5 }
 0xf07   : > { %s6914_s3 = sld [smem:[#allocation47_spill]]  ;;  %49 = sbr.rel (!%p47_p6) target bundleno = 32 (0x20), region = 240 }
 0xf0a   : > { %s6916_s5 = smov %s6911_s29 }
 0xf0c   :  { %4356 = vsyncpa [#allocation7], 1 }
 0xf0d   :  { %4358 = vsyncpa [#allocation7 + $0x1], 1 }
 0xf0e   :  { %4359 = vsyncpa [#allocation10], 1 }
 0xf0f   :  { %4360 = vsyncpa [#allocation13], 1 }
 0xf10   :  { %4361 = vsyncpa [#allocation16], 1 }
 0xf11   :  { %4362 = vsyncpa [#allocation19], 1 }
 0xf12   :  { %4363 = vsyncpa [#allocation22], 1 }
 0xf13   :  { %4364 = vsyncpa [#allocation25], 1 }
 0xf14   :  { %4365 = vsyncpa [#allocation28], 1 }
 0xf15   :  { %4366 = vsyncpa [#allocation31], 1 }
 0xf16   :  { %4367 = vsyncpa [#allocation8], 1 }
 0xf17   :  { %4369 = vsyncpa [#allocation8 + $0x1], 1 }

</bundles_post_ra>
